<compile_context>
chip_gen: v7x
topology: tpu7x:2x2x1
jax: 0.10.0
libtpu: 0.0.40
codegen_flags: <defaults>
</compile_context>

<pallas_src>
import math
import functools

import jax
import jax.numpy as jnp
from jax.experimental import pallas as pl
from jax.experimental.pallas import tpu as pltpu


# ---------------------------------------------------------------------------
# Small helpers
# ---------------------------------------------------------------------------
def _round_up(x, m):
    return ((x + m - 1) // m) * m


def _nbytes(a):
    return int(a.size) * a.dtype.itemsize


def _vmem_capacity_bytes():
    """Physical VMEM per TensorCore; conservative (v7x) fallback if the query fails."""
    try:
        cap = getattr(pltpu.get_tpu_info(), "vmem_capacity_bytes", None)
        if cap:
            return int(cap)
    except Exception:
        pass
    return 64 * 1024 * 1024


def _attention_tile_cap(embed_pad):
    big_vmem = _vmem_capacity_bytes() >= (100 * 1024 * 1024)   # v5e / v6e: 128 MiB
    if embed_pad >= 512 and not big_vmem:
        return 128          # keep f32 qkv + attention temps inside v7x's 64 MiB
    if embed_pad <= 256 and big_vmem:
        return 512
    return 256


def _pick_batch_tile(batch, cap):
    """Full batch if tiny; otherwise a multiple of 8, capped, sized so the grid
    has >= 2 steps (so dual-TensorCore parts get work on both cores)."""
    if batch <= 8:
        return batch
    return min(cap, _round_up((batch + 1) // 2, 8))


def _mha_vmem_limit_bytes(TB, n_act, S, Sq, Ep, out_cols, weights, cross):
    wbytes = 2 * sum(_nbytes(w) for w in weights)           # double-buffered residents
    abytes = 2 * n_act * TB * Ep * 4                        # double-buffered act blocks
    obytes = 2 * TB * out_cols * 4                          # double-buffered out block
    sbytes = n_act * TB * Ep * 2                            # bf16 stacking scratch
    if cross:
        pbytes = TB * Ep * 4 + S * TB * 2 * Ep * 4          # q + kv projections (f32)
    else:
        pbytes = S * TB * 3 * Ep * 4                        # fused qkv projection (f32)
    tbytes = (2 * S + Sq + 2) * TB * Ep * 4                 # q/k/v slices + attn accums
    est = int(1.25 * (wbytes + abytes + obytes + sbytes + pbytes + tbytes))
    return max(est, 32 * 1024 * 1024)


# ---------------------------------------------------------------------------
# Pallas kernels
# ---------------------------------------------------------------------------
def _mha_fusion_kernel(*args, n_mod, embed, embed_pad, cross, concat):
    """Fused multi-head-attention fusion for one batch tile.

    self:  args = mod_refs(S), wqkv, bqkv, wo, bo, mask_eh, mask_he, out, xs
    cross: args = verbal_ref, mod_refs(S), wq, bq, wkv, bkv, wo, bo,
                  mask_eh, mask_he, out, xs
    """
    S = n_mod
    E = embed
    Ep = embed_pad

    if cross:
        verbal_ref = args[0]
        mod_refs = args[1:1 + S]
        (wq_ref, bq_ref, wkv_ref, bkv_ref, wo_ref, bo_ref,
         meh_ref, mhe_ref, out_ref, xs) = args[1 + S:]
    else:
        mod_refs = args[:S]
        (wqkv_ref, bqkv_ref, wo_ref, bo_ref,
         meh_ref, mhe_ref, out_ref, xs) = args[S:]

    TB = mod_refs[0].shape[0]
    n_rows = (S + 1 if cross else S) * TB

    # ---- stage activations as a row-block slab (n_act*TB, Ep), bf16 ---------
    # Row-block layout keeps the projection GEMM operand a zero-cost view
    # (no (TB, P, E) sublane padding, no tile-crossing reshape).
    if Ep > E:
        # Zero the lane-padding columns every step: the padded weight rows then
        # multiply true zeros, never stale VMEM garbage (NaN-safe, cheap).
        xs[:, E:Ep] = jnp.zeros((n_rows, Ep - E), jnp.bfloat16)
    for p, r in enumerate(mod_refs):
        xs[p * TB:(p + 1) * TB, 0:E] = r[...].astype(jnp.bfloat16)
    if cross:
        xs[S * TB:(S + 1) * TB, 0:E] = verbal_ref[...].astype(jnp.bfloat16)

    # ---- projections: bf16 operands on the MXU, f32 accumulation ------------
    # (1/sqrt(head_dim) already folded into the Q weight columns.)
    if cross:
        # Split GEMMs: Q only for the verbal query block, K/V only for the
        # modality blocks (no projected-then-discarded columns).
        q = jnp.dot(xs[S * TB:(S + 1) * TB, :], wq_ref[...],
                    preferred_element_type=jnp.float32) + bq_ref[...]
        kv = jnp.dot(xs[0:S * TB, :], wkv_ref[...],
                     preferred_element_type=jnp.float32) + bkv_ref[...]
        k_all = kv[:, 0:Ep]
        v_all = kv[:, Ep:2 * Ep]
        q_rows = [q]                                        # Sq == 1
    else:
        qkv = jnp.dot(xs[...], wqkv_ref[...],
                      preferred_element_type=jnp.float32) + bqkv_ref[...]
        q_all = qkv[:, 0:Ep]                                # lane-aligned slices
        k_all = qkv[:, Ep:2 * Ep]
        v_all = qkv[:, 2 * Ep:3 * Ep]
        q_rows = [q_all[i * TB:(i + 1) * TB, :] for i in range(S)]
    k_rows = [k_all[j * TB:(j + 1) * TB, :] for j in range(S)]
    v_rows = [v_all[j * TB:(j + 1) * TB, :] for j in range(S)]

    meh = meh_ref[...]            # (Ep, H) bf16 block-diagonal head mask
    mhe = mhe_ref[...]            # (H, Ep) bf16 (transpose of the above)

    # ---- attention, fully unrolled over the tiny static key dimension -------
    attn_per_q = []
    for q_i in q_rows:
        s_list = []
        for j in range(S):
            prod = (q_i * k_rows[j]).astype(jnp.bfloat16)            # (TB, Ep)
            s_list.append(jnp.dot(prod, meh,                         # (TB, H)
                                  preferred_element_type=jnp.float32))
        m = s_list[0]
        for s_j in s_list[1:]:
            m = jnp.maximum(m, s_j)
        e_list = [jnp.exp(s_j - m) for s_j in s_list]
        denom = e_list[0]
        for e_j in e_list[1:]:
            denom = denom + e_j
        inv = pl.reciprocal(denom, approx=True)                      # EUP slot
        attn_i = None
        for j in range(S):
            p_j = (e_list[j] * inv).astype(jnp.bfloat16)             # (TB, H)
            w_j = jnp.dot(p_j, mhe, preferred_element_type=jnp.float32)
            contrib = w_j * v_rows[j]                                # (TB, Ep) f32
            attn_i = contrib if attn_i is None else attn_i + contrib
        attn_per_q.append(attn_i)

    # ---- output projection + modality reduction + ReLU ----------------------
    wo = wo_ref[...]
    bo = bo_ref[...]
    if concat:
        for i, attn_i in enumerate(attn_per_q):
            o_i = jnp.dot(attn_i.astype(jnp.bfloat16), wo,
                          preferred_element_type=jnp.float32) + bo
            out_ref[:, i * Ep:(i + 1) * Ep] = jnp.maximum(o_i, 0.0)  # 128-aligned
    else:
        # sum over positions folded through the linear projection:
        # sum_i (a_i @ Wo + bo) == (sum_i a_i) @ Wo + Sq * bo
        acc = attn_per_q[0]
        for a in attn_per_q[1:]:
            acc = acc + a
        o = jnp.dot(acc.astype(jnp.bfloat16), wo,
                    preferred_element_type=jnp.float32) + float(len(attn_per_q)) * bo
        out_ref[...] = jnp.maximum(o, 0.0)


def _sum_relu_kernel(*refs):
    *parts, out_ref = refs
    acc = parts[0][...].astype(jnp.float32)
    for r in parts[1:]:
        acc = acc + r[...].astype(jnp.float32)
    out_ref[...] = jnp.maximum(acc, 0.0)


def _concat_relu_kernel(*refs):
    *parts, out_ref = refs
    off = 0
    for r in parts:
        w = r.shape[-1]
        out_ref[:, off:off + w] = jnp.maximum(r[...].astype(jnp.float32), 0.0)
        off += w


# ---------------------------------------------------------------------------
# Wrapper "module"
# ---------------------------------------------------------------------------
class MultimodalFusionModelPallas:
    def __init__(self, fusion_model_name, embed_size, fusion_model_nhead,
                 fusion_model_dropout, key=None):
        self.fusion_model_name = fusion_model_name
        self.embed_size = embed_size
        self.nhead = fusion_model_nhead
        self.dropout = fusion_model_dropout
        # TODO(synk): training-mode attention dropout not implemented (eval semantics).

        self.has_attn = ('self_attention' in fusion_model_name
                         or 'cross_attention' in fusion_model_name)
        self.cross = fusion_model_name.startswith('cross_attention')
        self.embed_pad = _round_up(embed_size, 128)

        if self.has_attn:
            if key is None:
                key = jax.random.PRNGKey(0)
            E, H, Ep = embed_size, fusion_model_nhead, self.embed_pad
            assert E % H == 0
            Dh = E // H
            k_in, k_out = jax.random.split(key)

            def pad2(w):
                r, c = w.shape
                return jnp.pad(w, ((0, Ep - r), (0, Ep - c)))

            # torch MHA: in_proj_weight xavier_uniform over (3E, E), biases 0.
            bound_in = math.sqrt(6.0 / (3 * E + E))
            in_proj = jax.random.uniform(k_in, (3 * E, E), jnp.float32,
                                         -bound_in, bound_in)
            scale = 1.0 / math.sqrt(Dh)
            wq = pad2(in_proj[0 * E:1 * E, :].T * scale)     # scale folded into Q
            wk = pad2(in_proj[1 * E:2 * E, :].T)
            wv = pad2(in_proj[2 * E:3 * E, :].T)

            bound_out = math.sqrt(6.0 / (E + E))
            self.wo = pad2(jax.random.uniform(k_out, (E, E), jnp.float32,
                                              -bound_out, bound_out).T
                           ).astype(jnp.bfloat16)
            self.bo = jnp.zeros((1, Ep), jnp.float32)

            # Block-diagonal head masks (bf16 — exact 0/1) used to reduce /
            # broadcast across heads without splitting the lane dim into (H, Dh).
            head_id = jnp.arange(E, dtype=jnp.int32) // Dh
            mask = (head_id[:, None] == jnp.arange(H, dtype=jnp.int32)[None, :]
                    ).astype(jnp.float32)                     # (E, H)
            mask = jnp.pad(mask, ((0, Ep - E), (0, 0)))       # (Ep, H)
            self.mask_eh = mask.astype(jnp.bfloat16)
            self.mask_he = mask.T.astype(jnp.bfloat16)        # (H, Ep)

            if self.cross:
                self.wq = wq.astype(jnp.bfloat16)
                self.bq = jnp.zeros((1, Ep), jnp.float32)
                self.wkv = jnp.concatenate([wk, wv], axis=1).astype(jnp.bfloat16)
                self.bkv = jnp.zeros((1, 2 * Ep), jnp.float32)
                self.weights = (self.wq, self.bq, self.wkv, self.bkv,
                                self.wo, self.bo, self.mask_eh, self.mask_he)
            else:
                self.wqkv = jnp.concatenate([wq, wk, wv], axis=1).astype(jnp.bfloat16)
                self.bqkv = jnp.zeros((1, 3 * Ep), jnp.float32)
                self.weights = (self.wqkv, self.bqkv,
                                self.wo, self.bo, self.mask_eh, self.mask_he)

    # -- Pallas call helpers -------------------------------------------------
    def _run_mha(self, acts, *, cross, concat):
        n_act = len(acts)
        S = n_act - 1 if cross else n_act         # number of key/value modalities
        Sq = 1 if cross else S
        B, E = acts[0].shape
        Ep = self.embed_pad
        out_cols = Sq * Ep if concat else Ep      # lane-dense (multiple of 128)

        TB = _pick_batch_tile(B, _attention_tile_cap(Ep))
        grid = (pl.cdiv(B, TB),)

        act_specs = [pl.BlockSpec((TB, E), lambda i: (i, 0)) for _ in acts]
        # Constant index_map keeps the weights VMEM-resident across batch tiles.
        # TODO(synk): single-buffer these (pipeline_mode=pl.Buffered(1)) to halve
        # the resident-weight footprint on v7x once VMEM headroom demands it.
        w_specs = [pl.BlockSpec(w.shape, lambda i: (0, 0)) for w in self.weights]

        kernel = functools.partial(_mha_fusion_kernel, n_mod=S, embed=E,
                                   embed_pad=Ep, cross=cross, concat=concat)
        vmem_limit = _mha_vmem_limit_bytes(TB, n_act, S, Sq, Ep, out_cols,
                                           self.weights, cross)
        out = pl.pallas_call(
            kernel,
            out_shape=jax.ShapeDtypeStruct((B, out_cols), jnp.float32),
            grid=grid,
            in_specs=act_specs + w_specs,
            out_specs=pl.BlockSpec((TB, out_cols), lambda i: (i, 0)),
            scratch_shapes=[pltpu.VMEM((n_act * TB, Ep), jnp.bfloat16)],
            compiler_params=pltpu.CompilerParams(
                dimension_semantics=("parallel",),
                vmem_limit_bytes=vmem_limit),
        )(*acts, *self.weights)

        # Slice the lane padding back to the module's semantic width
        # (a no-op when embed_size is already a multiple of 128).
        if Ep != E:
            if concat:
                out = out.reshape(B, Sq, Ep)[:, :, :E].reshape(B, Sq * E)
            else:
                out = out[:, :E]
        return out

    def _run_sum(self, acts):
        B, E = acts[0].shape
        TB = _pick_batch_tile(B, cap=1024)        # HBM-bandwidth bound: big tiles
        return pl.pallas_call(
            _sum_relu_kernel,
            out_shape=jax.ShapeDtypeStruct((B, E), jnp.float32),
            grid=(pl.cdiv(B, TB),),
            in_specs=[pl.BlockSpec((TB, E), lambda i: (i, 0)) for _ in acts],
            out_specs=pl.BlockSpec((TB, E), lambda i: (i, 0)),
            compiler_params=pltpu.CompilerParams(
                dimension_semantics=("parallel",)),
        )(*acts)

    def _run_concat(self, acts):
        B = acts[0].shape[0]
        out_cols = sum(a.shape[-1] for a in acts)
        TB = _pick_batch_tile(B, cap=1024)
        return pl.pallas_call(
            _concat_relu_kernel,
            out_shape=jax.ShapeDtypeStruct((B, out_cols), jnp.float32),
            grid=(pl.cdiv(B, TB),),
            in_specs=[pl.BlockSpec((TB, a.shape[-1]), lambda i: (i, 0))
                      for a in acts],
            out_specs=pl.BlockSpec((TB, out_cols), lambda i: (i, 0)),
            compiler_params=pltpu.CompilerParams(
                dimension_semantics=("parallel",)),
        )(*acts)

    # -- forward -------------------------------------------------------------
    def __call__(self, hidden_states, verbal_embed=None):
        name = self.fusion_model_name
        if name == 'concat':
            return self._run_concat(list(hidden_states))
        if name == 'sum':
            return self._run_sum(list(hidden_states))
        if name in ('self_attention', 'self_attention_concat',
                    'cross_attention', 'cross_attention_concat'):
            cross = name.startswith('cross_attention')
            concat = name.endswith('_concat')
            acts = ([verbal_embed] + list(hidden_states)) if cross \
                else list(hidden_states)
            return self._run_mha(acts, cross=cross, concat=concat)
        raise ValueError(f"unknown fusion_model_name: {name}")


# ---------------------------------------------------------------------------
# Pure-JAX reference (same stored weights) for correctness checking
# ---------------------------------------------------------------------------
def _reference_forward(model, hidden_states, verbal_embed):
    name = model.fusion_model_name
    if name == 'concat':
        return jax.nn.relu(jnp.concatenate(hidden_states, axis=-1))
    if name == 'sum':
        return jax.nn.relu(jnp.sum(jnp.stack(hidden_states, axis=1), axis=1))

    E, H, Ep = model.embed_size, model.nhead, model.embed_pad
    Dh = E // H
    cross = name.startswith('cross_attention')
    x = jnp.stack(hidden_states, axis=1).astype(jnp.float32)        # (B, S, E)
    pad = ((0, 0), (0, 0), (0, Ep - E))
    xp = jnp.pad(x, pad)

    if cross:
        qp = jnp.pad(verbal_embed[:, None, :].astype(jnp.float32), pad)
        q = qp @ model.wq.astype(jnp.float32) + model.bq             # scale folded in
        kv = xp @ model.wkv.astype(jnp.float32) + model.bkv
        k, v = kv[..., :Ep], kv[..., Ep:]
    else:
        wqkv = model.wqkv.astype(jnp.float32)
        qkv = xp @ wqkv + model.bqkv
        q, k, v = qkv[..., :Ep], qkv[..., Ep:2 * Ep], qkv[..., 2 * Ep:]
    q, k, v = q[..., :E], k[..., :E], v[..., :E]                     # drop zero padding

    B, Sq, _ = q.shape
    S = x.shape[1]
    qh = q.reshape(B, Sq, H, Dh)
    kh = k.reshape(B, S, H, Dh)
    vh = v.reshape(B, S, H, Dh)
    s = jnp.einsum('bihd,bjhd->bhij', qh, kh)
    p = jax.nn.softmax(s, axis=-1)
    o = jnp.einsum('bhij,bjhd->bihd', p, vh).reshape(B, Sq, E)
    o = o @ model.wo.astype(jnp.float32)[:E, :E] + model.bo[:, :E]

    if name.endswith('_concat'):
        fused = o.reshape(B, Sq * E)
    elif cross:
        fused = o[:, 0, :]
    else:
        fused = jnp.sum(o, axis=1)
    return jax.nn.relu(fused)


# ---------------------------------------------------------------------------
if __name__ == "__main__":
    B, E, NHEAD, N_MODALITIES = 2, 32, 4, 3

    key = jax.random.PRNGKey(0)
    k_params, *k_inputs = jax.random.split(key, 2 + N_MODALITIES)

    hidden_states = [jax.random.normal(k_inputs[i], (B, E), jnp.float32)
                     for i in range(N_MODALITIES)]
    verbal_embed = jax.random.normal(k_inputs[-1], (B, E), jnp.float32)

    cases = [
        ('self_attention',         E,                1e-1),
        ('cross_attention',        E,                1e-1),
        ('self_attention_concat',  N_MODALITIES * E, 1e-1),
        ('cross_attention_concat', E,                1e-1),
        ('sum',                    E,                1e-4),
        ('concat',                 N_MODALITIES * E, 1e-4),
    ]
    for name, want_cols, tol in cases:
        model = MultimodalFusionModelPallas(name, E, NHEAD, 0.0, key=k_params)
        out = model(hidden_states, verbal_embed)
        jax.block_until_ready(out)
        assert out.shape == (B, want_cols), (name, out.shape)
        ref = _reference_forward(model, hidden_states, verbal_embed)
        assert bool(jnp.allclose(out, ref, atol=tol, rtol=tol)), name

    print("KERNEL_OK")
</pallas_src>

<mosaic_0001>
module attributes {stable_mosaic.version = 11 : i64} {
  func.func @_mha_fusion_kernel(%arg0: i32, %arg1: memref<2x32xf32, #tpu.memory_space<vmem>>, %arg2: memref<2x32xf32, #tpu.memory_space<vmem>>, %arg3: memref<2x32xf32, #tpu.memory_space<vmem>>, %arg4: memref<128x384xbf16, #tpu.memory_space<vmem>>, %arg5: memref<1x384xf32, #tpu.memory_space<vmem>>, %arg6: memref<128x128xbf16, #tpu.memory_space<vmem>>, %arg7: memref<1x128xf32, #tpu.memory_space<vmem>>, %arg8: memref<128x4xbf16, #tpu.memory_space<vmem>>, %arg9: memref<4x128xbf16, #tpu.memory_space<vmem>>, %arg10: memref<2x128xf32, #tpu.memory_space<vmem>>, %arg11: memref<6x128xbf16, #tpu.memory_space<vmem>>) attributes {dimension_semantics = [#tpu.dimension_semantics<parallel>], iteration_bounds = array<i64: 1>, scalar_prefetch = 0 : i64, scratch_operands = 1 : i64, tpu.core_type = #tpu.core_type<tc>, window_params = [{transform_indices = @transform_0, window_bounds = array<i64: 2, 32>}, {transform_indices = @transform_1, window_bounds = array<i64: 2, 32>}, {transform_indices = @transform_2, window_bounds = array<i64: 2, 32>}, {pipeline_mode = #tpu.pipeline_mode<synchronous>, transform_indices = @transform_3, window_bounds = array<i64: 128, 384>}, {pipeline_mode = #tpu.pipeline_mode<synchronous>, transform_indices = @transform_4, window_bounds = array<i64: 1, 384>}, {pipeline_mode = #tpu.pipeline_mode<synchronous>, transform_indices = @transform_5, window_bounds = array<i64: 128, 128>}, {pipeline_mode = #tpu.pipeline_mode<synchronous>, transform_indices = @transform_6, window_bounds = array<i64: 1, 128>}, {pipeline_mode = #tpu.pipeline_mode<synchronous>, transform_indices = @transform_7, window_bounds = array<i64: 128, 4>}, {pipeline_mode = #tpu.pipeline_mode<synchronous>, transform_indices = @transform_8, window_bounds = array<i64: 4, 128>}, {transform_indices = @transform_9, window_bounds = array<i64: 2, 128>}]} {
    %cst = arith.constant 0.000000e+00 : bf16
    %0 = vector.broadcast %cst : bf16 to vector<6x96xbf16>
    %c0 = arith.constant 0 : index
    %c32 = arith.constant 32 : index
    %1 = vector.load %arg11[%c0, %c32] : memref<6x128xbf16, #tpu.memory_space<vmem>>, vector<6x96xbf16>
    tpu.vector_store %arg11[%c0, %c32], %0 {strides = array<i32>} : memref<6x128xbf16, #tpu.memory_space<vmem>>, vector<6x96xbf16>,
    %c0_0 = arith.constant 0 : index
    %c0_1 = arith.constant 0 : index
    %2 = vector.load %arg1[%c0_0, %c0_1] : memref<2x32xf32, #tpu.memory_space<vmem>>, vector<2x32xf32>
    %3 = arith.truncf %2 : vector<2x32xf32> to vector<2x32xbf16>
    %c0_2 = arith.constant 0 : index
    %c0_3 = arith.constant 0 : index
    %4 = vector.load %arg11[%c0_2, %c0_3] : memref<6x128xbf16, #tpu.memory_space<vmem>>, vector<2x32xbf16>
    tpu.vector_store %arg11[%c0_2, %c0_3], %3 {strides = array<i32>} : memref<6x128xbf16, #tpu.memory_space<vmem>>, vector<2x32xbf16>,
    %c0_4 = arith.constant 0 : index
    %c0_5 = arith.constant 0 : index
    %5 = vector.load %arg2[%c0_4, %c0_5] : memref<2x32xf32, #tpu.memory_space<vmem>>, vector<2x32xf32>
    %6 = arith.truncf %5 : vector<2x32xf32> to vector<2x32xbf16>
    %c2 = arith.constant 2 : index
    %c0_6 = arith.constant 0 : index
    %7 = vector.load %arg11[%c2, %c0_6] : memref<6x128xbf16, #tpu.memory_space<vmem>>, vector<2x32xbf16>
    tpu.vector_store %arg11[%c2, %c0_6], %6 {strides = array<i32>} : memref<6x128xbf16, #tpu.memory_space<vmem>>, vector<2x32xbf16>,
    %c0_7 = arith.constant 0 : index
    %c0_8 = arith.constant 0 : index
    %8 = vector.load %arg3[%c0_7, %c0_8] : memref<2x32xf32, #tpu.memory_space<vmem>>, vector<2x32xf32>
    %9 = arith.truncf %8 : vector<2x32xf32> to vector<2x32xbf16>
    %c4 = arith.constant 4 : index
    %c0_9 = arith.constant 0 : index
    %10 = vector.load %arg11[%c4, %c0_9] : memref<6x128xbf16, #tpu.memory_space<vmem>>, vector<2x32xbf16>
    tpu.vector_store %arg11[%c4, %c0_9], %9 {strides = array<i32>} : memref<6x128xbf16, #tpu.memory_space<vmem>>, vector<2x32xbf16>,
    %c0_10 = arith.constant 0 : index
    %c0_11 = arith.constant 0 : index
    %11 = vector.load %arg11[%c0_10, %c0_11] : memref<6x128xbf16, #tpu.memory_space<vmem>>, vector<6x128xbf16>
    %c0_12 = arith.constant 0 : index
    %c0_13 = arith.constant 0 : index
    %12 = vector.load %arg4[%c0_12, %c0_13] : memref<128x384xbf16, #tpu.memory_space<vmem>>, vector<128x384xbf16>
    %cst_14 = arith.constant dense<0.000000e+00> : vector<6x384xf32>
    %13 = tpu.matmul %11, %12, %cst_14 {dimension_numbers = #tpu.dot_dimension_numbers<[1], [0], [0], [1], [0, 0, 1, 1], [], []>} : vector<6x128xbf16>, vector<128x384xbf16>, vector<6x384xf32> -> vector<6x384xf32>
    %c0_15 = arith.constant 0 : index
    %c0_16 = arith.constant 0 : index
    %14 = vector.load %arg5[%c0_15, %c0_16] : memref<1x384xf32, #tpu.memory_space<vmem>>, vector<1x384xf32>
    %15 = vector.broadcast %14 : vector<1x384xf32> to vector<6x384xf32>
    %16 = arith.addf %13, %15 : vector<6x384xf32>
    %17 = vector.extract_strided_slice %16 {offsets = [0, 0], sizes = [6, 128], strides = [1, 1]} : vector<6x384xf32> to vector<6x128xf32>
    %18 = vector.extract_strided_slice %16 {offsets = [0, 128], sizes = [6, 128], strides = [1, 1]} : vector<6x384xf32> to vector<6x128xf32>
    %19 = vector.extract_strided_slice %16 {offsets = [0, 256], sizes = [6, 128], strides = [1, 1]} : vector<6x384xf32> to vector<6x128xf32>
    %20 = vector.extract_strided_slice %17 {offsets = [0, 0], sizes = [2, 128], strides = [1, 1]} : vector<6x128xf32> to vector<2x128xf32>
    %21 = vector.extract_strided_slice %17 {offsets = [2, 0], sizes = [2, 128], strides = [1, 1]} : vector<6x128xf32> to vector<2x128xf32>
    %22 = vector.extract_strided_slice %17 {offsets = [4, 0], sizes = [2, 128], strides = [1, 1]} : vector<6x128xf32> to vector<2x128xf32>
    %23 = vector.extract_strided_slice %18 {offsets = [0, 0], sizes = [2, 128], strides = [1, 1]} : vector<6x128xf32> to vector<2x128xf32>
    %24 = vector.extract_strided_slice %18 {offsets = [2, 0], sizes = [2, 128], strides = [1, 1]} : vector<6x128xf32> to vector<2x128xf32>
    %25 = vector.extract_strided_slice %18 {offsets = [4, 0], sizes = [2, 128], strides = [1, 1]} : vector<6x128xf32> to vector<2x128xf32>
    %26 = vector.extract_strided_slice %19 {offsets = [0, 0], sizes = [2, 128], strides = [1, 1]} : vector<6x128xf32> to vector<2x128xf32>
    %27 = vector.extract_strided_slice %19 {offsets = [2, 0], sizes = [2, 128], strides = [1, 1]} : vector<6x128xf32> to vector<2x128xf32>
    %28 = vector.extract_strided_slice %19 {offsets = [4, 0], sizes = [2, 128], strides = [1, 1]} : vector<6x128xf32> to vector<2x128xf32>
    %c0_17 = arith.constant 0 : index
    %c0_18 = arith.constant 0 : index
    %29 = vector.load %arg8[%c0_17, %c0_18] : memref<128x4xbf16, #tpu.memory_space<vmem>>, vector<128x4xbf16>
    %c0_19 = arith.constant 0 : index
    %c0_20 = arith.constant 0 : index
    %30 = vector.load %arg9[%c0_19, %c0_20] : memref<4x128xbf16, #tpu.memory_space<vmem>>, vector<4x128xbf16>
    %31 = arith.mulf %20, %23 : vector<2x128xf32>
    %32 = arith.truncf %31 : vector<2x128xf32> to vector<2x128xbf16>
    %cst_21 = arith.constant dense<0.000000e+00> : vector<2x4xf32>
    %33 = tpu.matmul %32, %29, %cst_21 {dimension_numbers = #tpu.dot_dimension_numbers<[1], [0], [0], [1], [0, 0, 1, 1], [], []>} : vector<2x128xbf16>, vector<128x4xbf16>, vector<2x4xf32> -> vector<2x4xf32>
    %34 = arith.mulf %20, %24 : vector<2x128xf32>
    %35 = arith.truncf %34 : vector<2x128xf32> to vector<2x128xbf16>
    %cst_22 = arith.constant dense<0.000000e+00> : vector<2x4xf32>
    %36 = tpu.matmul %35, %29, %cst_22 {dimension_numbers = #tpu.dot_dimension_numbers<[1], [0], [0], [1], [0, 0, 1, 1], [], []>} : vector<2x128xbf16>, vector<128x4xbf16>, vector<2x4xf32> -> vector<2x4xf32>
    %37 = arith.mulf %20, %25 : vector<2x128xf32>
    %38 = arith.truncf %37 : vector<2x128xf32> to vector<2x128xbf16>
    %cst_23 = arith.constant dense<0.000000e+00> : vector<2x4xf32>
    %39 = tpu.matmul %38, %29, %cst_23 {dimension_numbers = #tpu.dot_dimension_numbers<[1], [0], [0], [1], [0, 0, 1, 1], [], []>} : vector<2x128xbf16>, vector<128x4xbf16>, vector<2x4xf32> -> vector<2x4xf32>
    %40 = arith.maximumf %33, %36 : vector<2x4xf32>
    %41 = arith.maximumf %40, %39 : vector<2x4xf32>
    %42 = arith.subf %33, %41 : vector<2x4xf32>
    %43 = math.exp %42 : vector<2x4xf32>
    %44 = arith.subf %36, %41 : vector<2x4xf32>
    %45 = math.exp %44 : vector<2x4xf32>
    %46 = arith.subf %39, %41 : vector<2x4xf32>
    %47 = math.exp %46 : vector<2x4xf32>
    %48 = arith.addf %43, %45 : vector<2x4xf32>
    %49 = arith.addf %48, %47 : vector<2x4xf32>
    %50 = tpu.reciprocal %49 {approx = true} : vector<2x4xf32> -> vector<2x4xf32>
    %51 = arith.mulf %43, %50 : vector<2x4xf32>
    %52 = arith.truncf %51 : vector<2x4xf32> to vector<2x4xbf16>
    %cst_24 = arith.constant dense<0.000000e+00> : vector<2x128xf32>
    %53 = tpu.matmul %52, %30, %cst_24 {dimension_numbers = #tpu.dot_dimension_numbers<[1], [0], [0], [1], [0, 0, 1, 1], [], []>} : vector<2x4xbf16>, vector<4x128xbf16>, vector<2x128xf32> -> vector<2x128xf32>
    %54 = arith.mulf %53, %26 : vector<2x128xf32>
    %55 = arith.mulf %45, %50 : vector<2x4xf32>
    %56 = arith.truncf %55 : vector<2x4xf32> to vector<2x4xbf16>
    %cst_25 = arith.constant dense<0.000000e+00> : vector<2x128xf32>
    %57 = tpu.matmul %56, %30, %cst_25 {dimension_numbers = #tpu.dot_dimension_numbers<[1], [0], [0], [1], [0, 0, 1, 1], [], []>} : vector<2x4xbf16>, vector<4x128xbf16>, vector<2x128xf32> -> vector<2x128xf32>
    %58 = arith.mulf %57, %27 : vector<2x128xf32>
    %59 = arith.addf %54, %58 : vector<2x128xf32>
    %60 = arith.mulf %47, %50 : vector<2x4xf32>
    %61 = arith.truncf %60 : vector<2x4xf32> to vector<2x4xbf16>
    %cst_26 = arith.constant dense<0.000000e+00> : vector<2x128xf32>
    %62 = tpu.matmul %61, %30, %cst_26 {dimension_numbers = #tpu.dot_dimension_numbers<[1], [0], [0], [1], [0, 0, 1, 1], [], []>} : vector<2x4xbf16>, vector<4x128xbf16>, vector<2x128xf32> -> vector<2x128xf32>
    %63 = arith.mulf %62, %28 : vector<2x128xf32>
    %64 = arith.addf %59, %63 : vector<2x128xf32>
    %65 = arith.mulf %21, %23 : vector<2x128xf32>
    %66 = arith.truncf %65 : vector<2x128xf32> to vector<2x128xbf16>
    %cst_27 = arith.constant dense<0.000000e+00> : vector<2x4xf32>
    %67 = tpu.matmul %66, %29, %cst_27 {dimension_numbers = #tpu.dot_dimension_numbers<[1], [0], [0], [1], [0, 0, 1, 1], [], []>} : vector<2x128xbf16>, vector<128x4xbf16>, vector<2x4xf32> -> vector<2x4xf32>
    %68 = arith.mulf %21, %24 : vector<2x128xf32>
    %69 = arith.truncf %68 : vector<2x128xf32> to vector<2x128xbf16>
    %cst_28 = arith.constant dense<0.000000e+00> : vector<2x4xf32>
    %70 = tpu.matmul %69, %29, %cst_28 {dimension_numbers = #tpu.dot_dimension_numbers<[1], [0], [0], [1], [0, 0, 1, 1], [], []>} : vector<2x128xbf16>, vector<128x4xbf16>, vector<2x4xf32> -> vector<2x4xf32>
    %71 = arith.mulf %21, %25 : vector<2x128xf32>
    %72 = arith.truncf %71 : vector<2x128xf32> to vector<2x128xbf16>
    %cst_29 = arith.constant dense<0.000000e+00> : vector<2x4xf32>
    %73 = tpu.matmul %72, %29, %cst_29 {dimension_numbers = #tpu.dot_dimension_numbers<[1], [0], [0], [1], [0, 0, 1, 1], [], []>} : vector<2x128xbf16>, vector<128x4xbf16>, vector<2x4xf32> -> vector<2x4xf32>
    %74 = arith.maximumf %67, %70 : vector<2x4xf32>
    %75 = arith.maximumf %74, %73 : vector<2x4xf32>
    %76 = arith.subf %67, %75 : vector<2x4xf32>
    %77 = math.exp %76 : vector<2x4xf32>
    %78 = arith.subf %70, %75 : vector<2x4xf32>
    %79 = math.exp %78 : vector<2x4xf32>
    %80 = arith.subf %73, %75 : vector<2x4xf32>
    %81 = math.exp %80 : vector<2x4xf32>
    %82 = arith.addf %77, %79 : vector<2x4xf32>
    %83 = arith.addf %82, %81 : vector<2x4xf32>
    %84 = tpu.reciprocal %83 {approx = true} : vector<2x4xf32> -> vector<2x4xf32>
    %85 = arith.mulf %77, %84 : vector<2x4xf32>
    %86 = arith.truncf %85 : vector<2x4xf32> to vector<2x4xbf16>
    %cst_30 = arith.constant dense<0.000000e+00> : vector<2x128xf32>
    %87 = tpu.matmul %86, %30, %cst_30 {dimension_numbers = #tpu.dot_dimension_numbers<[1], [0], [0], [1], [0, 0, 1, 1], [], []>} : vector<2x4xbf16>, vector<4x128xbf16>, vector<2x128xf32> -> vector<2x128xf32>
    %88 = arith.mulf %87, %26 : vector<2x128xf32>
    %89 = arith.mulf %79, %84 : vector<2x4xf32>
    %90 = arith.truncf %89 : vector<2x4xf32> to vector<2x4xbf16>
    %cst_31 = arith.constant dense<0.000000e+00> : vector<2x128xf32>
    %91 = tpu.matmul %90, %30, %cst_31 {dimension_numbers = #tpu.dot_dimension_numbers<[1], [0], [0], [1], [0, 0, 1, 1], [], []>} : vector<2x4xbf16>, vector<4x128xbf16>, vector<2x128xf32> -> vector<2x128xf32>
    %92 = arith.mulf %91, %27 : vector<2x128xf32>
    %93 = arith.addf %88, %92 : vector<2x128xf32>
    %94 = arith.mulf %81, %84 : vector<2x4xf32>
    %95 = arith.truncf %94 : vector<2x4xf32> to vector<2x4xbf16>
    %cst_32 = arith.constant dense<0.000000e+00> : vector<2x128xf32>
    %96 = tpu.matmul %95, %30, %cst_32 {dimension_numbers = #tpu.dot_dimension_numbers<[1], [0], [0], [1], [0, 0, 1, 1], [], []>} : vector<2x4xbf16>, vector<4x128xbf16>, vector<2x128xf32> -> vector<2x128xf32>
    %97 = arith.mulf %96, %28 : vector<2x128xf32>
    %98 = arith.addf %93, %97 : vector<2x128xf32>
    %99 = arith.mulf %22, %23 : vector<2x128xf32>
    %100 = arith.truncf %99 : vector<2x128xf32> to vector<2x128xbf16>
    %cst_33 = arith.constant dense<0.000000e+00> : vector<2x4xf32>
    %101 = tpu.matmul %100, %29, %cst_33 {dimension_numbers = #tpu.dot_dimension_numbers<[1], [0], [0], [1], [0, 0, 1, 1], [], []>} : vector<2x128xbf16>, vector<128x4xbf16>, vector<2x4xf32> -> vector<2x4xf32>
    %102 = arith.mulf %22, %24 : vector<2x128xf32>
    %103 = arith.truncf %102 : vector<2x128xf32> to vector<2x128xbf16>
    %cst_34 = arith.constant dense<0.000000e+00> : vector<2x4xf32>
    %104 = tpu.matmul %103, %29, %cst_34 {dimension_numbers = #tpu.dot_dimension_numbers<[1], [0], [0], [1], [0, 0, 1, 1], [], []>} : vector<2x128xbf16>, vector<128x4xbf16>, vector<2x4xf32> -> vector<2x4xf32>
    %105 = arith.mulf %22, %25 : vector<2x128xf32>
    %106 = arith.truncf %105 : vector<2x128xf32> to vector<2x128xbf16>
    %cst_35 = arith.constant dense<0.000000e+00> : vector<2x4xf32>
    %107 = tpu.matmul %106, %29, %cst_35 {dimension_numbers = #tpu.dot_dimension_numbers<[1], [0], [0], [1], [0, 0, 1, 1], [], []>} : vector<2x128xbf16>, vector<128x4xbf16>, vector<2x4xf32> -> vector<2x4xf32>
    %108 = arith.maximumf %101, %104 : vector<2x4xf32>
    %109 = arith.maximumf %108, %107 : vector<2x4xf32>
    %110 = arith.subf %101, %109 : vector<2x4xf32>
    %111 = math.exp %110 : vector<2x4xf32>
    %112 = arith.subf %104, %109 : vector<2x4xf32>
    %113 = math.exp %112 : vector<2x4xf32>
    %114 = arith.subf %107, %109 : vector<2x4xf32>
    %115 = math.exp %114 : vector<2x4xf32>
    %116 = arith.addf %111, %113 : vector<2x4xf32>
    %117 = arith.addf %116, %115 : vector<2x4xf32>
    %118 = tpu.reciprocal %117 {approx = true} : vector<2x4xf32> -> vector<2x4xf32>
    %119 = arith.mulf %111, %118 : vector<2x4xf32>
    %120 = arith.truncf %119 : vector<2x4xf32> to vector<2x4xbf16>
    %cst_36 = arith.constant dense<0.000000e+00> : vector<2x128xf32>
    %121 = tpu.matmul %120, %30, %cst_36 {dimension_numbers = #tpu.dot_dimension_numbers<[1], [0], [0], [1], [0, 0, 1, 1], [], []>} : vector<2x4xbf16>, vector<4x128xbf16>, vector<2x128xf32> -> vector<2x128xf32>
    %122 = arith.mulf %121, %26 : vector<2x128xf32>
    %123 = arith.mulf %113, %118 : vector<2x4xf32>
    %124 = arith.truncf %123 : vector<2x4xf32> to vector<2x4xbf16>
    %cst_37 = arith.constant dense<0.000000e+00> : vector<2x128xf32>
    %125 = tpu.matmul %124, %30, %cst_37 {dimension_numbers = #tpu.dot_dimension_numbers<[1], [0], [0], [1], [0, 0, 1, 1], [], []>} : vector<2x4xbf16>, vector<4x128xbf16>, vector<2x128xf32> -> vector<2x128xf32>
    %126 = arith.mulf %125, %27 : vector<2x128xf32>
    %127 = arith.addf %122, %126 : vector<2x128xf32>
    %128 = arith.mulf %115, %118 : vector<2x4xf32>
    %129 = arith.truncf %128 : vector<2x4xf32> to vector<2x4xbf16>
    %cst_38 = arith.constant dense<0.000000e+00> : vector<2x128xf32>
    %130 = tpu.matmul %129, %30, %cst_38 {dimension_numbers = #tpu.dot_dimension_numbers<[1], [0], [0], [1], [0, 0, 1, 1], [], []>} : vector<2x4xbf16>, vector<4x128xbf16>, vector<2x128xf32> -> vector<2x128xf32>
    %131 = arith.mulf %130, %28 : vector<2x128xf32>
    %132 = arith.addf %127, %131 : vector<2x128xf32>
    %c0_39 = arith.constant 0 : index
    %c0_40 = arith.constant 0 : index
    %133 = vector.load %arg6[%c0_39, %c0_40] : memref<128x128xbf16, #tpu.memory_space<vmem>>, vector<128x128xbf16>
    %c0_41 = arith.constant 0 : index
    %c0_42 = arith.constant 0 : index
    %134 = vector.load %arg7[%c0_41, %c0_42] : memref<1x128xf32, #tpu.memory_space<vmem>>, vector<1x128xf32>
    %135 = arith.addf %64, %98 : vector<2x128xf32>
    %136 = arith.addf %135, %132 : vector<2x128xf32>
    %137 = arith.truncf %136 : vector<2x128xf32> to vector<2x128xbf16>
    %cst_43 = arith.constant dense<0.000000e+00> : vector<2x128xf32>
    %138 = tpu.matmul %137, %133, %cst_43 {dimension_numbers = #tpu.dot_dimension_numbers<[1], [0], [0], [1], [0, 0, 1, 1], [], []>} : vector<2x128xbf16>, vector<128x128xbf16>, vector<2x128xf32> -> vector<2x128xf32>
    %cst_44 = arith.constant 3.000000e+00 : f32
    %139 = vector.broadcast %cst_44 : f32 to vector<1x128xf32>
    %140 = arith.mulf %139, %134 : vector<1x128xf32>
    %141 = vector.broadcast %140 : vector<1x128xf32> to vector<2x128xf32>
    %142 = arith.addf %138, %141 : vector<2x128xf32>
    %cst_45 = arith.constant 0.000000e+00 : f32
    %143 = vector.broadcast %cst_45 : f32 to vector<2x128xf32>
    %144 = arith.maximumf %142, %143 : vector<2x128xf32>
    %c0_46 = arith.constant 0 : index
    %c0_47 = arith.constant 0 : index
    %145 = vector.load %arg10[%c0_46, %c0_47] : memref<2x128xf32, #tpu.memory_space<vmem>>, vector<2x128xf32>
    tpu.vector_store %arg10[%c0_46, %c0_47], %144 {strides = array<i32>} : memref<2x128xf32, #tpu.memory_space<vmem>>, vector<2x128xf32>,
    return
  }
  func.func @transform_0(%arg0: i32) -> (i32, i32) {
    %c0_i32 = arith.constant 0 : i32
    %c0_i32_0 = arith.constant 0 : i32
    return %arg0, %c0_i32 : i32, i32
  }
  func.func @transform_1(%arg0: i32) -> (i32, i32) {
    %c0_i32 = arith.constant 0 : i32
    %c0_i32_0 = arith.constant 0 : i32
    return %arg0, %c0_i32 : i32, i32
  }
  func.func @transform_2(%arg0: i32) -> (i32, i32) {
    %c0_i32 = arith.constant 0 : i32
    %c0_i32_0 = arith.constant 0 : i32
    return %arg0, %c0_i32 : i32, i32
  }
  func.func @transform_3(%arg0: i32) -> (i32, i32) {
    %c0_i32 = arith.constant 0 : i32
    %c0_i32_0 = arith.constant 0 : i32
    %c0_i32_1 = arith.constant 0 : i32
    return %c0_i32, %c0_i32_0 : i32, i32
  }
  func.func @transform_4(%arg0: i32) -> (i32, i32) {
    %c0_i32 = arith.constant 0 : i32
    %c0_i32_0 = arith.constant 0 : i32
    %c0_i32_1 = arith.constant 0 : i32
    return %c0_i32, %c0_i32_0 : i32, i32
  }
  func.func @transform_5(%arg0: i32) -> (i32, i32) {
    %c0_i32 = arith.constant 0 : i32
    %c0_i32_0 = arith.constant 0 : i32
    %c0_i32_1 = arith.constant 0 : i32
    return %c0_i32, %c0_i32_0 : i32, i32
  }
  func.func @transform_6(%arg0: i32) -> (i32, i32) {
    %c0_i32 = arith.constant 0 : i32
    %c0_i32_0 = arith.constant 0 : i32
    %c0_i32_1 = arith.constant 0 : i32
    return %c0_i32, %c0_i32_0 : i32, i32
  }
  func.func @transform_7(%arg0: i32) -> (i32, i32) {
    %c0_i32 = arith.constant 0 : i32
    %c0_i32_0 = arith.constant 0 : i32
    %c0_i32_1 = arith.constant 0 : i32
    return %c0_i32, %c0_i32_0 : i32, i32
  }
  func.func @transform_8(%arg0: i32) -> (i32, i32) {
    %c0_i32 = arith.constant 0 : i32
    %c0_i32_0 = arith.constant 0 : i32
    %c0_i32_1 = arith.constant 0 : i32
    return %c0_i32, %c0_i32_0 : i32, i32
  }
  func.func @transform_9(%arg0: i32) -> (i32, i32) {
    %c0_i32 = arith.constant 0 : i32
    %c0_i32_0 = arith.constant 0 : i32
    return %arg0, %c0_i32 : i32, i32
  }
}

</mosaic_0001>

<bundles_post_ra>
// kernel: tpu_custom_call.1
= control target key start
LH: loop header
LB: loop body
LE: loop exit
PB: predicated region body
PF: predicated region fallthrough
CT: control target
= control target key end

     0   :  { %14 = vsyncpa [#allocation4], 0  ;;  %s2415_s0 = inlined_call_operand.vmem [shape: f32[2,32], index: 0, kind: input, shape index: {}]   ;;  %s2416_s1 = inlined_call_operand.vmem [shape: f32[2,32], index: 1, kind: input, shape index: {}]   ;;  %s2417_s2 = inlined_call_operand.vmem [shape: f32[2,32], index: 2, kind: input, shape index: {}]   ;;  %s2418_s3 = inlined_call_operand.hbm [shape: bf16[128,384], index: 3, kind: input, shape index: {}]   ;;  %s2419_s4 = inlined_call_operand.vmem [shape: f32[1,384], index: 4, kind: input, shape index: {}]   ;;  %s2420_s5 = inlined_call_operand.vmem [shape: bf16[128,128], index: 5, kind: input, shape index: {}]   ;;  %s2421_s6 = inlined_call_operand.vmem [shape: f32[1,128], index: 6, kind: input, shape index: {}]   ;;  %s2422_s7 = inlined_call_operand.vmem [shape: bf16[128,4], index: 7, kind: input, shape index: {}]   ;;  %s2423_s8 = inlined_call_operand.vmem [shape: bf16[4,128], index: 8, kind: input, shape index: {}]   ;;  %s2424_s9 = inlined_call_operand.hbm [shape: f32[2,128], index: 9, kind: output, shape index: {}]  }
   0x1   :  { %15 = vsyncpa [#allocation5], 0  ;;  %s1962_s30 = smov [#allocation3]   ;;  %s1914_s13 = scalar_lea.hbm %s2418_s3, 3072 }
   0x2   :  { %s27_s10 = sshll.u32 %s1962_s30, 4  ;;  %p1915_p0 = scmp.ne.s32.totalorder %s2418_s3, %s1914_s13  ;;  %s28_s10 = int_to_ptr.vmem [resolvable:$true] %s27_s10 }
   0x3   :  { %p1918_p1 = scmp.lt.u32.totalorder %s1914_s13, %s2418_s3 }
   0x5   :  { %p1920_p2 = pnand %p1918_p1, %p1915_p0 }
   0x7   :  { %1923 = shalt.err (!%p1920_p2)
}
   0x8   :  { %s1924_s18 = scalar_lea.vmem %s28_s10, 3072  ;;  %p1929_p4 = scmp.lt.s32.totalorder %s28_s10, %s28_s10 }
   0x9   :  { %p1925_p3 = scmp.ne.s32.totalorder %s28_s10, %s1924_s18  ;;  %p1930_p5 = scmp.lt.s32.totalorder %s1924_s18, %s1924_s18 }
   0xb   :  { %p1931_p6 = por %p1930_p5, %p1929_p4 }
   0xd   :  { %p1932_p7 = pnand %p1931_p6, %p1925_p3 }
   0xf   :  { %1935 = shalt.err (!%p1932_p7)
}
  0x10   :  { %s1963_s19 = smov 192   ;;  %s1964_s20 = smov 12  }
  0x11   :  { %33 = dma.hbm_to_vmem [thread:$0]  %s2418_s3, 3072, %s28_s10, [#allocation4], %s1963_s19, %s1963_s19, %s1964_s20  }
  0x12   :  { %1958 = dma.done.wait [#allocation4], 3072  }
  0x13   :  { %1959 = vsyncadd [#allocation4], 4294964224  ;;  %vm48_vm0 = vcmask 1042688   ;;  %v1965_v0 = vmov 0   ;;  %v1966_v1 = vmov 0.0   ;;  %vm1967_vm1 = vmmov 0  }
  0x14   :  { %49 = vst.msk [vmem:[#allocation2] sm:$0x7] %vm48_vm0, %v1965_v0  ;;  %282 = vmatprep.mubr.bf16.mxu0 %v1965_v0  ;;  %1561 = vmatprep.subr.bf16.mxu1 %v1966_v1  ;;  %v1842_v2 = vld [vmem:[#allocation3 + $0x4] ss:$12 sps:$4 sm:$0xff]   ;;  %v1844_v3 = vld [vmem:[#allocation3] ss:$12 sps:$4 sm:$0xff]   ;;  %v107_v43 = vlaneseq }
  0x15   :  { %1577 = vmatprep.mubr.msk.bf16.mxu1 %vm1967_vm1, %v1966_v1  ;;  %250 = vmatprep.subr.bf16.mxu0 %v1842_v2  ;;  %v1845_v4 = vld [vmem:[#allocation3 + $0x1c] ss:$12 sps:$4 sm:$0xff]   ;;  %v1847_v5 = vld [vmem:[#allocation3 + $0x18] ss:$12 sps:$4 sm:$0xff]   ;;  %v1848_v6 = vld [vmem:[#allocation3 + $0x34] ss:$12 sps:$4 sm:$0xff]  }
  0x16   :  { %251 = vmatpush1.bf16.msra.mxu0 %v1844_v3  ;;  %v1850_v7 = vld [vmem:[#allocation3 + $0x30] ss:$12 sps:$4 sm:$0xff]   ;;  %v1851_v8 = vld [vmem:[#allocation3 + $0x4c] ss:$12 sps:$4 sm:$0xff]   ;;  %vm52_vm2 = vcmask 253952   ;;  %vm61_vm3 = vcmask 254977  }
  0x17   :  { %252 = vmatprep.subr.bf16.mxu0 %v1845_v4  ;;  %v1853_v9 = vld [vmem:[#allocation3 + $0x48] ss:$12 sps:$4 sm:$0xff]   ;;  %v1854_v10 = vld [vmem:[#allocation3 + $0x64] ss:$12 sps:$4 sm:$0xff]   ;;  %v50_v11 = vld [vmem:[%s2415_s0] sm:$0x3] }
  0x18   :  { %v51_v12 = vpack.c.bf16 %v50_v11, %v50_v11  ;;  %v54_v13 = vld [vmem:[%s2416_s1] sm:$0x3]  ;;  %v1866_v17 = vld [vmem:[#allocation3 + $0x8] ss:$12 sps:$4 sm:$0xff]   ;;  %vm70_vm4 = vcmask 256002   ;;  %v2069_v37 = vld [vmem:[%s2422_s7 + $0x10] sm:$0xff]  }
  0x19   :  { %v63_v14 = vld [vmem:[%s2417_s2] sm:$0x3]  ;;  %v1442_v15 = vpack.c.bf16 %v54_v13, %v54_v13  ;;  %1562 = vmatpush3.bf16.msra.mxu1 %v1866_v17  ;;  %v1867_v20 = vld [vmem:[#allocation3 + $0x20] ss:$12 sps:$4 sm:$0xff]   ;;  %v1868_v23 = vld [vmem:[#allocation3 + $0x38] ss:$12 sps:$4 sm:$0xff]  }
  0x1a   :  { %253 = vmatpush1.bf16.msra.mxu0 %v1847_v5  ;;  %v1443_v16 = vpack.c.bf16 %v63_v14, %v63_v14  ;;  %53 = vst.msk [vmem:[#allocation2] sm:$0x1] %vm52_vm2, %v51_v12  ;;  %v1856_v21 = vld [vmem:[#allocation3 + $0x60] ss:$12 sps:$4 sm:$0xff]   ;;  %1563 = vmatprep.subr.bf16.mxu1 %v1966_v1  ;;  %v1857_v22 = vld [vmem:[#allocation3 + $0x7c] ss:$12 sps:$4 sm:$0xff]  }
  0x1b   :  { %254 = vmatprep.subr.bf16.mxu0 %v1848_v6  ;;  %v59_v18 = vrot.slane %v1442_v15, 7  ;;  %v1859_v24 = vld [vmem:[#allocation3 + $0x78] ss:$12 sps:$4 sm:$0xff]   ;;  %v1860_v25 = vld [vmem:[#allocation3 + $0x94] ss:$12 sps:$4 sm:$0xff]   ;;  %v2113_v41 = vld [vmem:[%s2422_s7 + $0x30] sm:$0xff]  }
  0x1c   :  { %v68_v19 = vrot.slane %v1443_v16, 6  ;;  %v1869_v26 = vld [vmem:[#allocation3 + $0x50] ss:$12 sps:$4 sm:$0xff]   ;;  %v1863_v28 = vld [vmem:[#allocation3 + $0xac] ss:$12 sps:$4 sm:$0xff]   ;;  %v2059_v35 = vld [vmem:[%s2422_s7 + $0x8] sm:$0xff]  }
  0x1d   :  { %62 = vst.msk [vmem:[#allocation2] sm:$0x2] %vm61_vm3, %v59_v18  ;;  %1564 = vmatpush3.bf16.msra.mxu1 %v1867_v20  ;;  %v1862_v27 = vld [vmem:[#allocation3 + $0x90] ss:$12 sps:$4 sm:$0xff]   ;;  %v1865_v29 = vld [vmem:[#allocation3 + $0xa8] ss:$12 sps:$4 sm:$0xff]  }
  0x1e   :  { %255 = vmatpush1.bf16.msra.mxu0 %v1850_v7  ;;  %71 = vst.msk [vmem:[#allocation2] sm:$0x4] %vm70_vm4, %v68_v19  ;;  %1565 = vmatprep.subr.bf16.mxu1 %v1966_v1  ;;  %v1870_v30 = vld [vmem:[#allocation3 + $0x68] ss:$12 sps:$4 sm:$0xff]   ;;  %v1871_v31 = vld [vmem:[#allocation3 + $0x80] ss:$12 sps:$4 sm:$0xff]  }
  0x1f   :  { %256 = vmatprep.subr.bf16.mxu0 %v1851_v8  ;;  %v2050_v33 = vld [vmem:[%s2422_s7] sm:$0xff]   ;;  %v1872_v34 = vld [vmem:[#allocation3 + $0x98] ss:$12 sps:$4 sm:$0xff]   ;;  %v2128_v44 = vshrl.u32 %v107_v43, 7  ;;  %vm547_vm5 = vcmask 1041408   ;;  %vm543_vm6 = vcmask 31744  }
  0x20   :  { %v1873_v36 = vld [vmem:[#allocation3 + $0xb0] ss:$12 sps:$4 sm:$0xff]   ;;  %v2077_v38 = vld [vmem:[%s2422_s7 + $0x18] sm:$0xff]   ;;  %v2097_v40 = vld [vmem:[%s2422_s7 + $0x28] sm:$0xff]   ;;  %s1968_s13 = smov [#allocation6]  }
  0x21   :  { %1566 = vmatpush3.bf16.msra.mxu1 %v1868_v23  ;;  %v2088_v39 = vld [vmem:[%s2422_s7 + $0x20] sm:$0xff]   ;;  %v2122_v42 = vld [vmem:[%s2422_s7 + $0x38] sm:$0xff]   ;;  %v109_v45 = vsub.s32 0, %v2128_v44  ;;  %v113_v47 = vsub.s32 1, %v2128_v44  ;;  %s1382_s14 = sshll.u32 %s1968_s13, 4  ;;  %s1383_s14 = int_to_ptr.vmem [resolvable:$true] %s1382_s14 }
  0x22   :  { %257 = vmatpush1.bf16.msra.mxu0 %v1853_v9  ;;  %1567 = vmatprep.subr.bf16.mxu1 %v1966_v1  ;;  %v2134_v46 = vld [vmem:[%s2419_s4] sm:$0x7]  ;;  %s1936_s15 = scalar_lea.vmem %s1383_s14, 32  ;;  %p1941_p9 = scmp.lt.s32.totalorder %s1383_s14, %s1383_s14 }
  0x23   :  { %258 = vmatprep.subr.bf16.mxu0 %v1854_v10  ;;  %v110_v48 = vrot.slane %v2134_v46, %v109_v45  ;;  %v114_v49 = vrot.slane %v2134_v46, %v113_v47  ;;  %v347_v7 = vld [vmem:[%s2423_s8] sm:$0x3]  ;;  %p1937_p8 = scmp.ne.s32.totalorder %s1383_s14, %s1936_s15  ;;  %p1942_p10 = scmp.lt.s32.totalorder %s1936_s15, %s1936_s15 }
  0x24   :  { %v2179_v8 = vsel %vm547_vm5, %v347_v7, 0 }
  0x25   :  { %1568 = vmatpush3.bf16.msra.mxu1 %v1869_v26  ;;  %v72_v32 = vld [vmem:[#allocation2] sm:$0x7]  ;;  %p1943_p11 = por %p1942_p10, %p1941_p9 }
  0x26   :  { %259 = vmatpush1.bf16.msra.mxu0 %v1856_v21  ;;  %1569 = vmatprep.subr.bf16.mxu1 %v1966_v1 }
  0x27   :  { %260 = vmatprep.subr.bf16.mxu0 %v1857_v22  ;;  %p1944_p12 = pnand %p1943_p11, %p1937_p8 }
  0x29   :  { %1570 = vmatpush3.bf16.msra.mxu1 %v1870_v30 }
  0x2a   :  { %261 = vmatpush1.bf16.msra.mxu0 %v1859_v24  ;;  %1571 = vmatprep.subr.bf16.mxu1 %v1966_v1 }
  0x2b   :  { %262 = vmatprep.subr.bf16.mxu0 %v1860_v25 }
  0x2d   :  { %1572 = vmatpush3.bf16.msra.mxu1 %v1871_v31 }
  0x2e   :  { %263 = vmatpush1.bf16.msra.mxu0 %v1862_v27  ;;  %1573 = vmatprep.subr.bf16.mxu1 %v1966_v1 }
  0x2f   :  { %264 = vmatprep.subr.bf16.mxu0 %v1863_v28 }
  0x31   :  { %1574 = vmatpush3.bf16.msra.mxu1 %v1872_v34 }
  0x32   :  { %265 = vmatpush1.bf16.msra.mxu0 %v1865_v29  ;;  %1575 = vmatprep.subr.bf16.mxu1 %v1966_v1 }
  0x33   :  { %1581 = vmatprep.subr.bf16.mxu0 %v1966_v1 }
  0x35   :  { %283 = vmatmul.mubr.bf16.vlgmr.msra.gmra.mrb[0].mxu0 %v72_v32  ;;  %1576 = vmatpush3.bf16.msra.mxu1 %v1873_v36 }
  0x36   :  { %1582 = vmatpush3.bf16.msra.mxu0 %v2050_v33  ;;  %1597 = vmatprep.mubr.msk.bf16.mxu0 %vm1967_vm1, %v1966_v1 }
  0x37   :  { %1583 = vmatprep.subr.bf16.mxu0 %v1966_v1  ;;  %1601 = vmatprep.subr.bf16.mxu1 %v1966_v1 }
  0x38   :  { %1578 = vmatmul.mubr.bf16.vlgmr.msra.gmra.mrb[0].mxu1 %v72_v32 }
  0x39   :  { %1602 = vmatpush3.bf16.msra.mxu1 %v2050_v33  ;;  %1617 = vmatprep.mubr.msk.bf16.mxu1 %vm1967_vm1, %v1966_v1 }
  0x3a   :  { %1584 = vmatpush3.bf16.msra.mxu0 %v2059_v35  ;;  %1603 = vmatprep.subr.bf16.mxu1 %v1966_v1 }
  0x3b   :  { %1585 = vmatprep.subr.bf16.mxu0 %v1966_v1 }
  0x3d   :  { %1604 = vmatpush3.bf16.msra.mxu1 %v2059_v35 }
  0x3e   :  { %1586 = vmatpush3.bf16.msra.mxu0 %v2069_v37  ;;  %1605 = vmatprep.subr.bf16.mxu1 %v1966_v1 }
  0x3f   :  { %1587 = vmatprep.subr.bf16.mxu0 %v1966_v1 }
  0x41   :  { %1606 = vmatpush3.bf16.msra.mxu1 %v2069_v37 }
  0x42   :  { %1588 = vmatpush3.bf16.msra.mxu0 %v2077_v38  ;;  %1607 = vmatprep.subr.bf16.mxu1 %v1966_v1 }
  0x43   :  { %1589 = vmatprep.subr.bf16.mxu0 %v1966_v1 }
  0x45   :  { %1608 = vmatpush3.bf16.msra.mxu1 %v2077_v38 }
  0x46   :  { %1590 = vmatpush3.bf16.msra.mxu0 %v2088_v39  ;;  %1609 = vmatprep.subr.bf16.mxu1 %v1966_v1 }
  0x47   :  { %1591 = vmatprep.subr.bf16.mxu0 %v1966_v1 }
  0x49   :  { %1610 = vmatpush3.bf16.msra.mxu1 %v2088_v39 }
  0x4a   :  { %1592 = vmatpush3.bf16.msra.mxu0 %v2097_v40  ;;  %1611 = vmatprep.subr.bf16.mxu1 %v1966_v1 }
  0x4b   :  { %1593 = vmatprep.subr.bf16.mxu0 %v1966_v1 }
  0x4d   :  { %1612 = vmatpush3.bf16.msra.mxu1 %v2097_v40 }
  0x4e   :  { %1613 = vmatprep.subr.bf16.mxu1 %v1966_v1  ;;  %1594 = vmatpush3.bf16.msra.mxu0 %v2113_v41 }
  0x4f   :  { %1595 = vmatprep.subr.bf16.mxu0 %v1966_v1 }
  0x51   :  { %1614 = vmatpush3.bf16.msra.mxu1 %v2113_v41 }
  0x52   :  { %1615 = vmatprep.subr.bf16.mxu1 %v1966_v1  ;;  %1596 = vmatpush3.bf16.msra.mxu0 %v2122_v42 }
  0x53   :  { %1621 = vmatprep.subr.bf16.mxu0 %v1966_v1 }
  0x55   :  { %1616 = vmatpush3.bf16.msra.mxu1 %v2122_v42 }
  0x56   :  { %1647 = vmatprep.subr.bf16.mxu1 %v1966_v1 }
 0x108   :  { %v284_v50 = vpop.f32.mrb[0].mxu0 }
 0x109   :  { %v285_v51 = vadd.f32 %v284_v50, %v110_v48  ;;  %v286_v52 = vpop.f32.mrb[1].mxu0 }
 0x10a   :  { %v287_v53 = vadd.f32 %v286_v52, %v114_v49  ;;  %v288_v54 = vpop.f32.mrb[2].mxu0 }
 0x10b   :  { %v289_v55 = vpop.f32.mrb[3].mxu0  ;;  %v2153_v2 = vpop.f32.mrb[0].mxu1 }
 0x10c   :  { %v439_v56 = vrot.slane %v287_v53, 2  ;;  %v483_v57 = vrot.slane %v287_v53, 4  ;;  %v691_v58 = vrot.slane %v287_v53, 6  ;;  %v348_v59 = vmul.f32 %v287_v53, %v285_v51  ;;  %v1579_v3 = vpop.f32.mrb[1].mxu1 }
 0x10d   :  { %v328_v4 = vpop.f32.mrb[2].mxu1 }
 0x10e   :  { %v2141_v60 = vpack.c.bf16 %v348_v59, %v348_v59  ;;  %v441_v61 = vmul.f32 %v439_v56, %v285_v51  ;;  %v485_v62 = vmul.f32 %v483_v57, %v285_v51  ;;  %v2143_v63 = vmul.f32 %v691_v58, %v285_v51  ;;  %v1580_v5 = vpop.f32.mrb[3].mxu1 }
 0x10f   :  { %v117_v57 = vsub.s32 2, %v2128_v44 }
 0x110   :  { %1598 = vmatmul.mubr.bf16.vlgmr.msra.gmra.mrb[4].mxu0 %v2141_v60  ;;  %v2146_v0 = vpack.c.bf16 %v441_v61, %v441_v61  ;;  %v2170_v6 = vpack.c.bf16 %v485_v62, %v485_v62  ;;  %v739_v52 = vrot.slane %v2141_v60, 1  ;;  %v694_v53 = vpack.c.bf16 %v2143_v63, %v2143_v63 }
 0x111   :  { %1622 = vmatpush3.bf16.msra.mxu0 %v2050_v33  ;;  %1637 = vmatprep.mubr.msk.bf16.mxu0 %vm1967_vm1, %v1966_v1  ;;  %v118_v58 = vrot.slane %v2134_v46, %v117_v57 }
 0x112   :  { %1618 = vmatmul.mubr.bf16.vlgmr.msra.gmra.mrb[4].mxu1 %v2146_v0  ;;  %1623 = vmatprep.subr.bf16.mxu0 %v1966_v1  ;;  %v696_v54 = vrot.slane %v694_v53, 1  ;;  %v782_v55 = vrot.slane %v2146_v0, 1  ;;  %v1021_v56 = vrot.slane %v694_v53, 2 }
 0x113   :  { %1649 = vmatprep.mubr.msk.bf16.mxu1 %vm1967_vm1, %v1966_v1  ;;  %1648 = vmatpush3.bf16.msra.mxu1 %v2179_v8  ;;  %v2279_v59 = vadd.f32 %v2153_v2, %v118_v58 }
 0x114   :  { %1653 = vmatprep.subr.bf16.mxu1 %v1966_v1 }
 0x115   :  { %1624 = vmatpush3.bf16.msra.mxu0 %v2059_v35  ;;  %v2282_v61 = vrot.slane %v2279_v59, 2  ;;  %v2287_v46 = vrot.slane %v2279_v59, 4 }
 0x116   :  { %1625 = vmatprep.subr.bf16.mxu0 %v1966_v1 }
 0x119   :  { %1626 = vmatpush3.bf16.msra.mxu0 %v2069_v37 }
 0x11a   :  { %1627 = vmatprep.subr.bf16.mxu0 %v1966_v1 }
 0x11d   :  { %1628 = vmatpush3.bf16.msra.mxu0 %v2077_v38 }
 0x11e   :  { %1629 = vmatprep.subr.bf16.mxu0 %v1966_v1 }
 0x121   :  { %1630 = vmatpush3.bf16.msra.mxu0 %v2088_v39 }
 0x122   :  { %1631 = vmatprep.subr.bf16.mxu0 %v1966_v1 }
 0x125   :  { %1632 = vmatpush3.bf16.msra.mxu0 %v2097_v40 }
 0x126   :  { %1633 = vmatprep.subr.bf16.mxu0 %v1966_v1 }
 0x129   :  { %1634 = vmatpush3.bf16.msra.mxu0 %v2113_v41 }
 0x12a   :  { %1635 = vmatprep.subr.bf16.mxu0 %v1966_v1 }
 0x12d   :  { %1636 = vmatpush3.bf16.msra.mxu0 %v2122_v42 }
 0x12e   :  { %1641 = vmatprep.subr.bf16.mxu0 %v1966_v1 }
 0x130   :  { %1638 = vmatmul.mubr.bf16.vlgmr.msra.gmra.mrb[8].mxu0 %v2170_v6 }
 0x131   :  { %1643 = vmatprep.mubr.msk.bf16.mxu0 %vm1967_vm1, %v1966_v1  ;;  %1642 = vmatpush3.bf16.msra.mxu0 %v2179_v8 }
 0x132   :  { %1679 = vmatprep.subr.bf16.mxu0 %v1966_v1 }
 0x1e3   :  { %v432_v9 = vpop.f32.mrb[4].mxu0 }
 0x1e4   :  { %v1599_v10 = vpop.f32.mrb[5].mxu0 }
 0x1e5   :  { %v435_v11 = vpop.f32.mrb[6].mxu0  ;;  %v477_v12 = vpop.f32.mrb[4].mxu1 }
 0x1e6   :  { %v527_v13 = vmax.f32 %v432_v9, %v477_v12  ;;  %v1600_v14 = vpop.f32.mrb[7].mxu0  ;;  %v1619_v15 = vpop.f32.mrb[5].mxu1 }
 0x1e7   :  { %v480_v16 = vpop.f32.mrb[6].mxu1 }
 0x1e8   :  { %v1620_v17 = vpop.f32.mrb[7].mxu1 }
 0x203   :  { %v521_v18 = vpop.f32.mrb[8].mxu0 }
 0x204   :  { %v528_v19 = vmax.f32 %v527_v13, %v521_v18  ;;  %v1639_v20 = vpop.f32.mrb[9].mxu0 }
 0x205   :  { %v524_v21 = vpop.f32.mrb[10].mxu0 }
 0x206   :  { %v529_v22 = vsub.f32 %v432_v9, %v528_v19  ;;  %v532_v23 = vsub.f32 %v477_v12, %v528_v19  ;;  %v535_v24 = vsub.f32 %v521_v18, %v528_v19  ;;  %v1640_v25 = vpop.f32.mrb[11].mxu0 }
 0x208   :  { %v530_v26 = vmul.f32 1.442695, %v529_v22  ;;  %v533_v27 = vmul.f32 1.442695, %v532_v23  ;;  %v536_v28 = vmul.f32 1.442695, %v535_v24 }
 0x20a   :  { %1890 = vpow2.f32 %v530_v26 }
 0x20b   :  { %1892 = vpow2.f32 %v533_v27 }
 0x20c   :  { %1894 = vpow2.f32 %v536_v28 }
 0x214   :  { %v1891_v29 = vpop.eup %1890 }
 0x215   :  { %v1893_v30 = vpop.eup %1892 }
 0x216   :  { %v538_v31 = vadd.f32 %v1893_v30, %v1891_v29  ;;  %v1895_v32 = vpop.eup %1894 }
 0x218   :  { %v539_v34 = vadd.f32 %v1895_v32, %v538_v31 }
 0x21a   :  { %1896 = vrcp.f32 %v539_v34 }
 0x224   :  { %v1897_v36 = vpop.eup %1896 }
 0x225   :  { %v541_v43 = vmul.f32 %v1897_v36, %v1891_v29  ;;  %v592_v47 = vmul.f32 %v1897_v36, %v1893_v30  ;;  %v642_v48 = vmul.f32 %v1897_v36, %v1895_v32 }
 0x227   :  { %v542_v49 = vpack.c.bf16 %v541_v43, %v541_v43  ;;  %v593_v50 = vpack.c.bf16 %v592_v47, %v592_v47  ;;  %v643_v51 = vpack.c.bf16 %v642_v48, %v642_v48 }
 0x229   :  { %1644 = vmatmul.mubr.msk.bf16.vlgmr.msra.gmra.mrb[12].mxu0 %vm543_vm6, %v542_v49  ;;  %1650 = vmatmul.mubr.msk.bf16.vlgmr.msra.gmra.mrb[8].mxu1 %vm543_vm6, %v593_v50 }
 0x22a   :  { %1654 = vmatpush3.bf16.msra.mxu1 %v2179_v8  ;;  %1680 = vmatpush3.bf16.msra.mxu0 %v2050_v33 }
 0x22b   :  { %1681 = vmatprep.subr.bf16.mxu0 %v1966_v1  ;;  %1655 = vmatprep.mubr.msk.bf16.mxu1 %vm1967_vm1, %v1966_v1 }
 0x22c   :  { %1659 = vmatprep.subr.bf16.mxu1 %v1966_v1  ;;  %1695 = vmatprep.mubr.msk.bf16.mxu0 %vm1967_vm1, %v1966_v1 }
 0x22e   :  { %1682 = vmatpush3.bf16.msra.mxu0 %v2059_v35 }
 0x22f   :  { %1683 = vmatprep.subr.bf16.mxu0 %v1966_v1 }
 0x231   :  { %1656 = vmatmul.mubr.msk.bf16.vlgmr.msra.gmra.mrb[12].mxu1 %vm543_vm6, %v643_v51 }
 0x232   :  { %1660 = vmatpush3.bf16.msra.mxu1 %v2050_v33  ;;  %1684 = vmatpush3.bf16.msra.mxu0 %v2069_v37 }
 0x233   :  { %1661 = vmatprep.subr.bf16.mxu1 %v1966_v1  ;;  %1685 = vmatprep.subr.bf16.mxu0 %v1966_v1 }
 0x234   :  { %1675 = vmatprep.mubr.msk.bf16.mxu1 %vm1967_vm1, %v1966_v1 }
 0x236   :  { %1662 = vmatpush3.bf16.msra.mxu1 %v2059_v35  ;;  %1686 = vmatpush3.bf16.msra.mxu0 %v2077_v38 }
 0x237   :  { %1663 = vmatprep.subr.bf16.mxu1 %v1966_v1  ;;  %1687 = vmatprep.subr.bf16.mxu0 %v1966_v1 }
 0x23a   :  { %1664 = vmatpush3.bf16.msra.mxu1 %v2069_v37  ;;  %1688 = vmatpush3.bf16.msra.mxu0 %v2088_v39 }
 0x23b   :  { %1665 = vmatprep.subr.bf16.mxu1 %v1966_v1  ;;  %1689 = vmatprep.subr.bf16.mxu0 %v1966_v1 }
 0x23e   :  { %1666 = vmatpush3.bf16.msra.mxu1 %v2077_v38  ;;  %1690 = vmatpush3.bf16.msra.mxu0 %v2097_v40 }
 0x23f   :  { %1667 = vmatprep.subr.bf16.mxu1 %v1966_v1  ;;  %1691 = vmatprep.subr.bf16.mxu0 %v1966_v1 }
 0x242   :  { %1668 = vmatpush3.bf16.msra.mxu1 %v2088_v39  ;;  %1692 = vmatpush3.bf16.msra.mxu0 %v2113_v41 }
 0x243   :  { %1669 = vmatprep.subr.bf16.mxu1 %v1966_v1  ;;  %1693 = vmatprep.subr.bf16.mxu0 %v1966_v1 }
 0x246   :  { %1670 = vmatpush3.bf16.msra.mxu1 %v2097_v40  ;;  %1694 = vmatpush3.bf16.msra.mxu0 %v2122_v42 }
 0x247   :  { %1671 = vmatprep.subr.bf16.mxu1 %v1966_v1  ;;  %1719 = vmatprep.subr.bf16.mxu0 %v1966_v1 }
 0x249   :  { %1696 = vmatmul.mubr.bf16.vlgmr.msra.gmra.mrb[16].mxu0 %v739_v52 }
 0x24a   :  { %1672 = vmatpush3.bf16.msra.mxu1 %v2113_v41  ;;  %1720 = vmatpush3.bf16.msra.mxu0 %v2179_v8 }
 0x24b   :  { %1673 = vmatprep.subr.bf16.mxu1 %v1966_v1  ;;  %1721 = vmatprep.mubr.msk.bf16.mxu0 %vm1967_vm1, %v1966_v1 }
 0x24c   :  { %1725 = vmatprep.subr.bf16.mxu0 %v1966_v1 }
 0x24e   :  { %1674 = vmatpush3.bf16.msra.mxu1 %v2122_v42 }
 0x24f   :  { %1699 = vmatprep.subr.bf16.mxu1 %v1966_v1 }
 0x251   :  { %1676 = vmatmul.mubr.bf16.vlgmr.msra.gmra.mrb[16].mxu1 %v696_v54 }
 0x252   :  { %1700 = vmatpush3.bf16.msra.mxu1 %v2050_v33  ;;  %1715 = vmatprep.mubr.msk.bf16.mxu1 %vm1967_vm1, %v1966_v1 }
 0x253   :  { %1701 = vmatprep.subr.bf16.mxu1 %v1966_v1 }
 0x256   :  { %1702 = vmatpush3.bf16.msra.mxu1 %v2059_v35 }
 0x257   :  { %1703 = vmatprep.subr.bf16.mxu1 %v1966_v1 }
 0x25a   :  { %1704 = vmatpush3.bf16.msra.mxu1 %v2069_v37 }
 0x25b   :  { %1705 = vmatprep.subr.bf16.mxu1 %v1966_v1 }
 0x25e   :  { %1706 = vmatpush3.bf16.msra.mxu1 %v2077_v38 }
 0x25f   :  { %1707 = vmatprep.subr.bf16.mxu1 %v1966_v1 }
 0x262   :  { %1708 = vmatpush3.bf16.msra.mxu1 %v2088_v39 }
 0x263   :  { %1709 = vmatprep.subr.bf16.mxu1 %v1966_v1 }
 0x266   :  { %1710 = vmatpush3.bf16.msra.mxu1 %v2097_v40 }
 0x267   :  { %1711 = vmatprep.subr.bf16.mxu1 %v1966_v1 }
 0x26a   :  { %1712 = vmatpush3.bf16.msra.mxu1 %v2113_v41 }
 0x26b   :  { %1713 = vmatprep.subr.bf16.mxu1 %v1966_v1 }
 0x26e   :  { %1714 = vmatpush3.bf16.msra.mxu1 %v2122_v42 }
 0x26f   :  { %1757 = vmatprep.subr.bf16.mxu1 %v1966_v1 }
 0x271   :  { %1716 = vmatmul.mubr.bf16.vlgmr.msra.gmra.mrb[20].mxu1 %v782_v55 }
 0x272   :  { %1758 = vmatpush3.bf16.msra.mxu1 %v2050_v33  ;;  %1773 = vmatprep.mubr.msk.bf16.mxu1 %vm1967_vm1, %v1966_v1 }
 0x273   :  { %1759 = vmatprep.subr.bf16.mxu1 %v1966_v1 }
 0x276   :  { %1760 = vmatpush3.bf16.msra.mxu1 %v2059_v35 }
 0x277   :  { %1761 = vmatprep.subr.bf16.mxu1 %v1966_v1 }
 0x27a   :  { %1762 = vmatpush3.bf16.msra.mxu1 %v2069_v37 }
 0x27b   :  { %1763 = vmatprep.subr.bf16.mxu1 %v1966_v1 }
 0x27e   :  { %1764 = vmatpush3.bf16.msra.mxu1 %v2077_v38 }
 0x27f   :  { %1765 = vmatprep.subr.bf16.mxu1 %v1966_v1 }
 0x282   :  { %1766 = vmatpush3.bf16.msra.mxu1 %v2088_v39 }
 0x283   :  { %1767 = vmatprep.subr.bf16.mxu1 %v1966_v1 }
 0x286   :  { %1768 = vmatpush3.bf16.msra.mxu1 %v2097_v40 }
 0x287   :  { %1769 = vmatprep.subr.bf16.mxu1 %v1966_v1 }
 0x28a   :  { %1770 = vmatpush3.bf16.msra.mxu1 %v2113_v41 }
 0x28b   :  { %1771 = vmatprep.subr.bf16.mxu1 %v1966_v1 }
 0x28e   :  { %1772 = vmatpush3.bf16.msra.mxu1 %v2122_v42 }
 0x28f   :  { %1797 = vmatprep.subr.bf16.mxu1 %v1966_v1 }
 0x291   :  { %1774 = vmatmul.mubr.bf16.vlgmr.msra.gmra.mrb[24].mxu1 %v1021_v56 }
 0x292   :  { %1798 = vmatpush3.bf16.msra.mxu1 %v2179_v8  ;;  %1799 = vmatprep.mubr.msk.bf16.mxu1 %vm1967_vm1, %v1966_v1 }
 0x293   :  { %1803 = vmatprep.subr.bf16.mxu1 %v1966_v1 }
 0x2fc   :  { %v585_v62 = vpop.f32.mrb[12].mxu0  ;;  %v631_v63 = vpop.f32.mrb[8].mxu1 }
 0x2fd   :  { %v591_v0 = vmul.f32 %v585_v62, %v2279_v59  ;;  %v640_v3 = vmul.f32 %v2282_v61, %v631_v63  ;;  %v1645_v4 = vpop.f32.mrb[13].mxu0  ;;  %v1651_v5 = vpop.f32.mrb[9].mxu1 }
 0x2fe   :  { %v588_v7 = vpop.f32.mrb[14].mxu0  ;;  %v634_v9 = vpop.f32.mrb[10].mxu1 }
 0x2ff   :  { %v641_v10 = vadd.f32 %v640_v3, %v591_v0  ;;  %v1646_v11 = vpop.f32.mrb[15].mxu0  ;;  %v1652_v12 = vpop.f32.mrb[11].mxu1  ;;  %v979_v7 = vrot.slane %v2170_v6, 2 }
 0x304   :  { %v681_v2 = vpop.f32.mrb[12].mxu1 }
 0x305   :  { %v689_v13 = vmul.f32 %v2287_v46, %v681_v2  ;;  %v1657_v14 = vpop.f32.mrb[13].mxu1 }
 0x306   :  { %v684_v15 = vpop.f32.mrb[14].mxu1 }
 0x307   :  { %v2290_v16 = vadd.f32 %v689_v13, %v641_v10  ;;  %v1658_v17 = vpop.f32.mrb[15].mxu1 }
 0x31c   :  { %v775_v18 = vpop.f32.mrb[16].mxu0 }
 0x31d   :  { %v1697_v19 = vpop.f32.mrb[17].mxu0 }
 0x31e   :  { %v778_v20 = vpop.f32.mrb[18].mxu0 }
 0x31f   :  { %v1698_v21 = vpop.f32.mrb[19].mxu0 }
 0x324   :  { %v732_v22 = vpop.f32.mrb[16].mxu1 }
 0x325   :  { %v824_v23 = vmax.f32 %v732_v22, %v775_v18  ;;  %v1677_v24 = vpop.f32.mrb[17].mxu1 }
 0x326   :  { %v735_v25 = vpop.f32.mrb[18].mxu1 }
 0x327   :  { %v1678_v26 = vpop.f32.mrb[19].mxu1 }
 0x344   :  { %v818_v27 = vpop.f32.mrb[20].mxu1 }
 0x345   :  { %v825_v28 = vmax.f32 %v824_v23, %v818_v27  ;;  %v1717_v29 = vpop.f32.mrb[21].mxu1 }
 0x346   :  { %v821_v30 = vpop.f32.mrb[22].mxu1 }
 0x347   :  { %v826_v31 = vsub.f32 %v732_v22, %v825_v28  ;;  %v829_v32 = vsub.f32 %v775_v18, %v825_v28  ;;  %v832_v34 = vsub.f32 %v818_v27, %v825_v28  ;;  %v1718_v36 = vpop.f32.mrb[23].mxu1 }
 0x349   :  { %v827_v43 = vmul.f32 1.442695, %v826_v31  ;;  %v830_v47 = vmul.f32 1.442695, %v829_v32  ;;  %v833_v48 = vmul.f32 1.442695, %v832_v34 }
 0x34b   :  { %1898 = vpow2.f32 %v827_v43 }
 0x34c   :  { %1900 = vpow2.f32 %v830_v47 }
 0x34d   :  { %1902 = vpow2.f32 %v833_v48 }
 0x355   :  { %v1899_v49 = vpop.eup %1898 }
 0x356   :  { %v1901_v50 = vpop.eup %1900 }
 0x357   :  { %v835_v51 = vadd.f32 %v1901_v50, %v1899_v49  ;;  %v1903_v52 = vpop.eup %1902 }
 0x359   :  { %v836_v53 = vadd.f32 %v1903_v52, %v835_v51 }
 0x35b   :  { %1904 = vrcp.f32 %v836_v53 }
 0x364   :  { %v2292_v54 = vpop.f32.mrb[24].mxu1 }
 0x365   :  { %v1905_v55 = vpop.eup %1904  ;;  %v1775_v56 = vpop.f32.mrb[25].mxu1 }
 0x366   :  { %v1060_v57 = vpop.f32.mrb[26].mxu1  ;;  %v838_v58 = vmul.f32 %v1905_v55, %v1899_v49  ;;  %v884_v62 = vmul.f32 %v1905_v55, %v1901_v50  ;;  %v931_v63 = vmul.f32 %v1905_v55, %v1903_v52  ;;  %v1882_v55 = vld [vmem:[%s2420_s5] sm:$0xff]  }
 0x367   :  { %v1776_v0 = vpop.f32.mrb[27].mxu1  ;;  %v1883_v57 = vld [vmem:[%s2420_s5 + $0x8] sm:$0xff]  }
 0x368   :  { %v839_v3 = vpack.c.bf16 %v838_v58, %v838_v58  ;;  %v885_v4 = vpack.c.bf16 %v884_v62, %v884_v62  ;;  %v932_v5 = vpack.c.bf16 %v931_v63, %v931_v63  ;;  %v1885_v58 = vld [vmem:[%s2420_s5 + $0x18] sm:$0xff]   ;;  %v1886_v62 = vld [vmem:[%s2420_s5 + $0x20] sm:$0xff]   ;;  %v1887_v63 = vld [vmem:[%s2420_s5 + $0x28] sm:$0xff]  }
 0x369   :  { %v1888_v0 = vld [vmem:[%s2420_s5 + $0x30] sm:$0xff]  }
 0x36a   :  { %1722 = vmatmul.mubr.msk.bf16.vlgmr.msra.gmra.mrb[20].mxu0 %vm543_vm6, %v839_v3  ;;  %v1889_v3 = vld [vmem:[%s2420_s5 + $0x38] sm:$0xff]  }
 0x36b   :  { %1726 = vmatpush3.bf16.msra.mxu0 %v2179_v8  ;;  %1727 = vmatprep.mubr.msk.bf16.mxu0 %vm1967_vm1, %v1966_v1 }
 0x36c   :  { %1731 = vmatprep.subr.bf16.mxu0 %v1966_v1 }
 0x372   :  { %1728 = vmatmul.mubr.msk.bf16.vlgmr.msra.gmra.mrb[24].mxu0 %vm543_vm6, %v885_v4 }
 0x373   :  { %1732 = vmatpush3.bf16.msra.mxu0 %v2179_v8  ;;  %1733 = vmatprep.mubr.msk.bf16.mxu0 %vm1967_vm1, %v1966_v1 }
 0x374   :  { %1737 = vmatprep.subr.bf16.mxu0 %v1966_v1 }
 0x37a   :  { %1734 = vmatmul.mubr.msk.bf16.vlgmr.msra.gmra.mrb[28].mxu0 %vm543_vm6, %v932_v5 }
 0x37b   :  { %1738 = vmatpush3.bf16.msra.mxu0 %v2050_v33  ;;  %1753 = vmatprep.mubr.msk.bf16.mxu0 %vm1967_vm1, %v1966_v1 }
 0x37c   :  { %1739 = vmatprep.subr.bf16.mxu0 %v1966_v1 }
 0x37f   :  { %1740 = vmatpush3.bf16.msra.mxu0 %v2059_v35 }
 0x380   :  { %1741 = vmatprep.subr.bf16.mxu0 %v1966_v1 }
 0x383   :  { %1742 = vmatpush3.bf16.msra.mxu0 %v2069_v37 }
 0x384   :  { %1743 = vmatprep.subr.bf16.mxu0 %v1966_v1 }
 0x387   :  { %1744 = vmatpush3.bf16.msra.mxu0 %v2077_v38 }
 0x388   :  { %1745 = vmatprep.subr.bf16.mxu0 %v1966_v1 }
 0x38b   :  { %1746 = vmatpush3.bf16.msra.mxu0 %v2088_v39 }
 0x38c   :  { %1747 = vmatprep.subr.bf16.mxu0 %v1966_v1 }
 0x38f   :  { %1748 = vmatpush3.bf16.msra.mxu0 %v2097_v40 }
 0x390   :  { %1749 = vmatprep.subr.bf16.mxu0 %v1966_v1 }
 0x393   :  { %1750 = vmatpush3.bf16.msra.mxu0 %v2113_v41 }
 0x394   :  { %1751 = vmatprep.subr.bf16.mxu0 %v1966_v1 }
 0x397   :  { %1752 = vmatpush3.bf16.msra.mxu0 %v2122_v42 }
 0x398   :  { %1777 = vmatprep.subr.bf16.mxu0 %v1966_v1 }
 0x39a   :  { %1754 = vmatmul.mubr.bf16.vlgmr.msra.gmra.mrb[32].mxu0 %v979_v7 }
 0x39b   :  { %1778 = vmatpush3.bf16.msra.mxu0 %v2050_v33  ;;  %1793 = vmatprep.mubr.msk.bf16.mxu0 %vm1967_vm1, %v1966_v1  ;;  %v1063_v33 = vrot.slane %v2141_v60, 2 }
 0x39c   :  { %1779 = vmatprep.subr.bf16.mxu0 %v1966_v1 }
 0x39f   :  { %1780 = vmatpush3.bf16.msra.mxu0 %v2059_v35 }
 0x3a0   :  { %1781 = vmatprep.subr.bf16.mxu0 %v1966_v1 }
 0x3a3   :  { %1782 = vmatpush3.bf16.msra.mxu0 %v2069_v37 }
 0x3a4   :  { %1783 = vmatprep.subr.bf16.mxu0 %v1966_v1 }
 0x3a7   :  { %1784 = vmatpush3.bf16.msra.mxu0 %v2077_v38 }
 0x3a8   :  { %1785 = vmatprep.subr.bf16.mxu0 %v1966_v1 }
 0x3ab   :  { %1786 = vmatpush3.bf16.msra.mxu0 %v2088_v39 }
 0x3ac   :  { %1787 = vmatprep.subr.bf16.mxu0 %v1966_v1 }
 0x3af   :  { %1788 = vmatpush3.bf16.msra.mxu0 %v2097_v40 }
 0x3b0   :  { %1789 = vmatprep.subr.bf16.mxu0 %v1966_v1 }
 0x3b3   :  { %1790 = vmatpush3.bf16.msra.mxu0 %v2113_v41 }
 0x3b4   :  { %1791 = vmatprep.subr.bf16.mxu0 %v1966_v1 }
 0x3b7   :  { %1792 = vmatpush3.bf16.msra.mxu0 %v2122_v42 }
 0x3ba   :  { %1794 = vmatmul.mubr.bf16.vlgmr.msra.gmra.mrb[36].mxu0 %v1063_v33 }
 0x43d   :  { %v877_v35 = vpop.f32.mrb[20].mxu0 }
 0x43e   :  { %v883_v37 = vmul.f32 %v877_v35, %v2279_v59  ;;  %v1723_v38 = vpop.f32.mrb[21].mxu0 }
 0x43f   :  { %v880_v39 = vpop.f32.mrb[22].mxu0 }
 0x440   :  { %v1724_v6 = vpop.f32.mrb[23].mxu0 }
 0x445   :  { %v923_v9 = vpop.f32.mrb[24].mxu0 }
 0x446   :  { %v929_v40 = vmul.f32 %v923_v9, %v2282_v61  ;;  %v1729_v10 = vpop.f32.mrb[25].mxu0 }
 0x447   :  { %v926_v11 = vpop.f32.mrb[26].mxu0 }
 0x448   :  { %v930_v12 = vadd.f32 %v929_v40, %v883_v37  ;;  %v1730_v41 = vpop.f32.mrb[27].mxu0 }
 0x44d   :  { %v970_v2 = vpop.f32.mrb[28].mxu0 }
 0x44e   :  { %v976_v13 = vmul.f32 %v970_v2, %v2287_v46  ;;  %v1735_v42 = vpop.f32.mrb[29].mxu0 }
 0x44f   :  { %v973_v14 = vpop.f32.mrb[30].mxu0  ;;  %v1275_v42 = vld [vmem:[%s2421_s6] sm:$0x1] }
 0x450   :  { %v977_v60 = vadd.f32 %v976_v13, %v930_v12  ;;  %v1736_v15 = vpop.f32.mrb[31].mxu0 }
 0x452   :  { %v2346_v17 = vadd.f32 %v977_v60, %v2290_v16 }
 0x46d   :  { %v1015_v18 = vpop.f32.mrb[32].mxu0 }
 0x46e   :  { %v1105_v19 = vmax.f32 %v1015_v18, %v2292_v54  ;;  %v1755_v20 = vpop.f32.mrb[33].mxu0 }
 0x46f   :  { %v1018_v21 = vpop.f32.mrb[34].mxu0 }
 0x470   :  { %v1756_v22 = vpop.f32.mrb[35].mxu0 }
 0x48d   :  { %v1099_v23 = vpop.f32.mrb[36].mxu0 }
 0x48e   :  { %v1106_v24 = vmax.f32 %v1105_v19, %v1099_v23  ;;  %v1795_v25 = vpop.f32.mrb[37].mxu0 }
 0x48f   :  { %v1102_v26 = vpop.f32.mrb[38].mxu0 }
 0x490   :  { %v1107_v27 = vsub.f32 %v1015_v18, %v1106_v24  ;;  %v1110_v28 = vsub.f32 %v2292_v54, %v1106_v24  ;;  %v1113_v29 = vsub.f32 %v1099_v23, %v1106_v24  ;;  %v1796_v30 = vpop.f32.mrb[39].mxu0 }
 0x492   :  { %v1108_v31 = vmul.f32 1.442695, %v1107_v27  ;;  %v1111_v32 = vmul.f32 1.442695, %v1110_v28  ;;  %v1114_v34 = vmul.f32 1.442695, %v1113_v29 }
 0x494   :  { %1906 = vpow2.f32 %v1108_v31 }
 0x495   :  { %1908 = vpow2.f32 %v1111_v32 }
 0x496   :  { %1910 = vpow2.f32 %v1114_v34 }
 0x49e   :  { %v1907_v16 = vpop.eup %1906 }
 0x49f   :  { %v1909_v36 = vpop.eup %1908 }
 0x4a0   :  { %v1116_v43 = vadd.f32 %v1909_v36, %v1907_v16  ;;  %v1911_v47 = vpop.eup %1910 }
 0x4a2   :  { %v1117_v48 = vadd.f32 %v1911_v47, %v1116_v43 }
 0x4a4   :  { %1912 = vrcp.f32 %v1117_v48 }
 0x4ae   :  { %v1913_v49 = vpop.eup %1912 }
 0x4af   :  { %v1119_v50 = vmul.f32 %v1913_v49, %v1907_v16  ;;  %v1165_v51 = vmul.f32 %v1913_v49, %v1909_v36  ;;  %v1212_v52 = vmul.f32 %v1913_v49, %v1911_v47 }
 0x4b1   :  { %v1120_v53 = vpack.c.bf16 %v1119_v50, %v1119_v50  ;;  %v1166_v54 = vpack.c.bf16 %v1165_v51, %v1165_v51  ;;  %v1213_v56 = vpack.c.bf16 %v1212_v52, %v1212_v52 }
 0x4b3   :  { %1800 = vmatmul.mubr.msk.bf16.vlgmr.msra.gmra.mrb[28].mxu1 %vm543_vm6, %v1120_v53 }
 0x4b4   :  { %1804 = vmatpush3.bf16.msra.mxu1 %v2179_v8  ;;  %1805 = vmatprep.mubr.msk.bf16.mxu1 %vm1967_vm1, %v1966_v1 }
 0x4b5   :  { %1809 = vmatprep.subr.bf16.mxu1 %v1966_v1 }
 0x4bb   :  { %1806 = vmatmul.mubr.msk.bf16.vlgmr.msra.gmra.mrb[32].mxu1 %vm543_vm6, %v1166_v54 }
 0x4bc   :  { %1810 = vmatpush3.bf16.msra.mxu1 %v2179_v8  ;;  %1811 = vmatprep.mubr.msk.bf16.mxu1 %vm1967_vm1, %v1966_v1  ;;  %v1884_v8 = vld [vmem:[%s2420_s5 + $0x10] sm:$0xff]  }
 0x4bd   :  { %1815 = vmatprep.subr.bf16.mxu1 %v1966_v1 }
 0x4c3   :  { %1812 = vmatmul.mubr.msk.bf16.vlgmr.msra.gmra.mrb[36].mxu1 %vm543_vm6, %v1213_v56 }
 0x4c4   :  { %1816 = vmatpush3.bf16.msra.mxu1 %v1882_v55  ;;  %1831 = vmatprep.mubr.msk.bf16.mxu1 %vm1967_vm1, %v1966_v1 }
 0x4c5   :  { %1817 = vmatprep.subr.bf16.mxu1 %v1966_v1 }
 0x4c8   :  { %1818 = vmatpush3.bf16.msra.mxu1 %v1883_v57 }
 0x4c9   :  { %1819 = vmatprep.subr.bf16.mxu1 %v1966_v1 }
 0x4cc   :  { %1820 = vmatpush3.bf16.msra.mxu1 %v1884_v8 }
 0x4cd   :  { %1821 = vmatprep.subr.bf16.mxu1 %v1966_v1 }
 0x4d0   :  { %1822 = vmatpush3.bf16.msra.mxu1 %v1885_v58 }
 0x4d1   :  { %1823 = vmatprep.subr.bf16.mxu1 %v1966_v1 }
 0x4d4   :  { %1824 = vmatpush3.bf16.msra.mxu1 %v1886_v62 }
 0x4d5   :  { %1825 = vmatprep.subr.bf16.mxu1 %v1966_v1 }
 0x4d8   :  { %1826 = vmatpush3.bf16.msra.mxu1 %v1887_v63 }
 0x4d9   :  { %1827 = vmatprep.subr.bf16.mxu1 %v1966_v1 }
 0x4dc   :  { %1828 = vmatpush3.bf16.msra.mxu1 %v1888_v0 }
 0x4dd   :  { %1829 = vmatprep.subr.bf16.mxu1 %v1966_v1 }
 0x4e0   :  { %1830 = vmatpush3.bf16.msra.mxu1 %v1889_v3 }
 0x586   :  { %v1158_v4 = vpop.f32.mrb[28].mxu1 }
 0x587   :  { %v1164_v5 = vmul.f32 %v1158_v4, %v2279_v59  ;;  %v1801_v7 = vpop.f32.mrb[29].mxu1 }
 0x588   :  { %v1161_v33 = vpop.f32.mrb[30].mxu1 }
 0x589   :  { %v1802_v35 = vpop.f32.mrb[31].mxu1 }
 0x58e   :  { %v1204_v37 = vpop.f32.mrb[32].mxu1 }
 0x58f   :  { %v1210_v38 = vmul.f32 %v1204_v37, %v2282_v61  ;;  %v1807_v39 = vpop.f32.mrb[33].mxu1  ;;  %v1279_v61 = vmul.f32 3.0, %v1275_v42 }
 0x590   :  { %v1207_v6 = vpop.f32.mrb[34].mxu1 }
 0x591   :  { %v1211_v9 = vadd.f32 %v1210_v38, %v1164_v5  ;;  %v1808_v40 = vpop.f32.mrb[35].mxu1  ;;  %v1284_v14 = vrot.slane %v1279_v61, %v109_v45 }
 0x596   :  { %v1251_v10 = vpop.f32.mrb[36].mxu1 }
 0x597   :  { %v1257_v1 = vmul.f32 %v1251_v10, %v2287_v46  ;;  %v1813_v11 = vpop.f32.mrb[37].mxu1 }
 0x598   :  { %v1254_v12 = vpop.f32.mrb[38].mxu1 }
 0x599   :  { %v1258_v41 = vadd.f32 %v1257_v1, %v1211_v9  ;;  %v1814_v2 = vpop.f32.mrb[39].mxu1 }
 0x59b   :  { %v1277_v13 = vadd.f32 %v2346_v17, %v1258_v41 }
 0x59d   :  { %v1278_v59 = vpack.c.bf16 %v1277_v13, %v1277_v13 }
 0x59f   :  { %1832 = vmatmul.mubr.bf16.vlgmr.msra.gmra.mrb[40].mxu1 %v1278_v59 }
 0x672   :  { %v1368_v60 = vpop.f32.mrb[40].mxu1 }
 0x673   :  { %v1369_v46 = vadd.f32 %v1368_v60, %v1284_v14  ;;  %v1833_v15 = vpop.f32.mrb[41].mxu1 }
 0x674   :  { %v1371_v18 = vpop.f32.mrb[42].mxu1 }
 0x675   :  { %v1374_v19 = vmax.f32 %v1369_v46, 0.0  ;;  %v1834_v20 = vpop.f32.mrb[43].mxu1 }
 0x677   :  { %1375 = vst [vmem:[#allocation6] sm:$0x3] %v1374_v19 }
 0x678   :  { %1947 = shalt.err (!%p1944_p12)
}
 0x679   :  { %s1948_s17 = scalar_lea.hbm %s2424_s9, 32 }
 0x67a   :  { %p1949_p13 = scmp.ne.s32.totalorder %s2424_s9, %s1948_s17  ;;  %p1952_p0 = scmp.lt.u32.totalorder %s1948_s17, %s2424_s9 }
 0x67c   :  { %p1954_p1 = pnand %p1952_p0, %p1949_p13 }
 0x67e   :  { %1957 = shalt.err (!%p1954_p1)
}
 0x67f   :  { %1385 = dma.vmem_to_hbm [thread:$0]  %s1383_s14, 32, %s2424_s9, [#allocation5]  }
 0x680   :  { %1960 = dma.done.wait [#allocation5], 32  }
 0x681   :  { %1961 = vsyncadd [#allocation5], 4294967264 }
 0x682   :  { %1389 = vsyncpa [#allocation4], 1 }
 0x683   :  { %1390 = vsyncpa [#allocation5], 1 }

</bundles_post_ra>
